<compile_context>
chip_gen: v7x
topology: tpu7x:2x2x1
jax: 0.10.0
libtpu: 0.0.40
codegen_flags: <defaults>
</compile_context>

<pallas_src>
import jax
import jax.numpy as jnp
from jax.experimental import pallas as pl
from jax.experimental.pallas import tpu as pltpu


def _round_up(x, m):
    return ((x + m - 1) // m) * m


def _pad_gate_rows(w, H, Hp):
    """(3H, C) -> (3Hp, C): place gate k's rows at a 128-aligned offset k*Hp."""
    C = w.shape[1]
    out = jnp.zeros((3 * Hp, C), w.dtype)
    for k in range(3):
        out = out.at[k * Hp:k * Hp + H, :].set(w[k * H:(k + 1) * H])
    return out


def _select_tiles(N, L, D, H, time_chunk):
    """Generation-aware tile selection: fit blocks into this chip's VMEM."""
    Hp = _round_up(H, 128)
    Dp = _round_up(D, 128)
    NB = min(_round_up(N, 8), 256 if N >= 256 else 128)
    T = max(1, min(time_chunk, L))

    try:
        vmem_cap = int(pltpu.get_tpu_info().vmem_capacity_bytes)
    except Exception:
        vmem_cap = 64 * 1024 * 1024          # v7x-safe fallback
    budget = int(vmem_cap * 0.75)

    def need(T_, NB_):
        return (2 * T_ * NB_ * Dp * 2        # x blocks (bf16, double-buffered)
                + 2 * NB_ * Hp * 4           # h0 blocks
                + 2 * Dp * 3 * Hp * 2        # W_ih^T (bf16, resident)
                + 2 * Hp * 3 * Hp * 2        # W_hh^T (bf16, resident)
                + 2 * (3 * Hp + Hp) * 4      # folded bias + b_hn
                + 2 * NB_ * Hp * 4           # h output blocks
                + T_ * NB_ * 3 * Hp * 4)     # gi scratch (f32)

    while need(T, NB) > budget and T > 1:
        T = max(1, T // 2)
    while need(T, NB) > budget and NB > 8:
        NB = max(8, _round_up(NB // 2, 8))

    vmem_limit = min(budget, max(2 * need(T, NB), 32 * 1024 * 1024))
    return Hp, Dp, NB, T, vmem_limit


def many_to_one_gru(x, h0, w_ih, w_hh, b_ih, b_hh, w_out, b_out, *, time_chunk=32):
    """x: (N, L, D) batch-major (like PyTorch). Returns (y (N, D), h (N, H))."""
    N, L, D = x.shape
    H = h0.shape[-1]
    f32, bf16 = jnp.float32, jnp.bfloat16

    Hp, Dp, NB, T, vmem_limit = _select_tiles(N, L, D, H, time_chunk)
    Np = _round_up(N, NB)
    Lp = _round_up(L, T)
    need_mask = Lp > L
    unroll = True if T <= 8 else 4

    # ---- pad & re-lay out parameters (each gate block at a 128-aligned lane offset) ----
    wih_p = jnp.pad(_pad_gate_rows(w_ih, H, Hp), ((0, 0), (0, Dp - D)))   # (3Hp, Dp)
    whh_p = jnp.pad(_pad_gate_rows(w_hh, H, Hp), ((0, 0), (0, Hp - H)))   # (3Hp, Hp)
    bih_p = _pad_gate_rows(b_ih[:, None], H, Hp)[:, 0]                    # (3Hp,)
    bhh_p = _pad_gate_rows(b_hh[:, None], H, Hp)[:, 0]                    # (3Hp,)

    wih_t = wih_p.T.astype(bf16)             # (Dp, 3Hp)
    whh_t = whh_p.T.astype(bf16)             # (Hp, 3Hp)

    # Fold b_ih (all gates) + b_hh (r, z gates) into the input path; b_hn stays
    # in-kernel since n = tanh(gi_n + r * (gh_n + b_hn)).
    bias_fold = (bih_p + bhh_p.at[2 * Hp:].set(0.0)).reshape(1, 3 * Hp).astype(f32)
    b_hn = bhh_p[2 * Hp:].reshape(1, Hp).astype(f32)                      # (1, Hp)

    # ---- stream x itself (bf16, time-major); no gi HBM round trip, no concatenate ----
    x_t = jnp.zeros((Lp, Np, Dp), bf16).at[:L, :N, :D].set(
        jnp.transpose(x, (1, 0, 2)).astype(bf16))
    h0_pad = jnp.zeros((Np, Hp), f32).at[:N, :H].set(h0)

    def gru_kernel(x_ref, h0_ref, wih_ref, whh_ref, bias_ref, bhn_ref,
                   h_out_ref, gi_scr):
        t_chunk = pl.program_id(1)
        Tb, NBb, Dpb = x_ref.shape
        Hpb = h0_ref.shape[1]

        # h_out block index is constant across the time axis -> resident accumulator.
        @pl.when(t_chunk == 0)
        def _():
            h_out_ref[...] = h0_ref[...]

        # Input-path gates for this whole time chunk: ONE big MXU GEMM, hoisted
        # out of the serial recurrence, result kept in VMEM scratch.
        xb = x_ref[...].reshape(Tb * NBb, Dpb)                            # bf16
        gi = jnp.dot(xb, wih_ref[...], preferred_element_type=jnp.float32)
        gi_scr[...] = (gi + bias_ref[...]).reshape(Tb, NBb, 3 * Hpb)

        whh = whh_ref[...]                                                # (Hp, 3Hp) bf16
        # hoisted broadcast: JAX does not CSE broadcast_in_dim inside the loop
        bhn = jnp.broadcast_to(bhn_ref[...], (NBb, Hpb))

        def step(t, h):
            g = gi_scr[t]                                                 # (NB, 3Hp) f32
            gh = jnp.dot(h.astype(whh.dtype), whh,
                         preferred_element_type=jnp.float32)              # (NB, 3Hp)
            pre_r = g[:, :Hpb] + gh[:, :Hpb]
            pre_z = g[:, Hpb:2 * Hpb] + gh[:, Hpb:2 * Hpb]
            # sigmoid(x) == 0.5*tanh(0.5*x)+0.5 : one EUP push per gate instead of two
            r = 0.5 * jnp.tanh(0.5 * pre_r) + 0.5
            z = 0.5 * jnp.tanh(0.5 * pre_z) + 0.5
            n = jnp.tanh(g[:, 2 * Hpb:] + r * (gh[:, 2 * Hpb:] + bhn))
            h_new = n + z * (h - n)            # == (1-z)*n + z*h, one fewer VPU op
            if need_mask:
                valid = (t_chunk * Tb + t) < L  # padded timesteps: keep h unchanged
                h_new = jnp.where(valid, h_new, h)
            return h_new

        h = jax.lax.fori_loop(0, Tb, step, h_out_ref[...], unroll=unroll)
        h_out_ref[...] = h

    const = lambda shape: pl.BlockSpec(shape, lambda b, t: (0,) * len(shape))

    h_pad = pl.pallas_call(
        gru_kernel,
        out_shape=jax.ShapeDtypeStruct((Np, Hp), f32),
        grid_spec=pltpu.PrefetchScalarGridSpec(
            num_scalar_prefetch=0,
            grid=(Np // NB, Lp // T),                  # (batch chunks, time chunks)
            in_specs=[
                pl.BlockSpec((T, NB, Dp), lambda b, t: (t, b, 0)),   # x chunk (bf16)
                pl.BlockSpec((NB, Hp), lambda b, t: (b, 0)),         # h0
                const((Dp, 3 * Hp)),                                 # W_ih^T (bf16)
                const((Hp, 3 * Hp)),                                 # W_hh^T (bf16)
                const((1, 3 * Hp)),                                  # folded bias
                const((1, Hp)),                                      # b_hn
            ],
            out_specs=pl.BlockSpec((NB, Hp), lambda b, t: (b, 0)),   # h (accumulator)
            scratch_shapes=[pltpu.VMEM((T, NB, 3 * Hp), f32)],       # per-chunk gi
        ),
        compiler_params=pltpu.CompilerParams(
            dimension_semantics=("parallel", "arbitrary"),  # batch || cores; time serial
            vmem_limit_bytes=vmem_limit,
        ),
    )(x_t, h0_pad, wih_t, whh_t, bias_fold, b_hn)

    h = h_pad[:N, :H]
    # Output head used exactly once -> plain XLA GEMM outside the recurrence kernel.
    y = jnp.dot(h.astype(bf16), w_out.T.astype(bf16),
                preferred_element_type=f32) + b_out
    return y, h


def _reference(x, h0, w_ih, w_hh, b_ih, b_hh, w_out, b_out):
    """Pure-JAX reference matching torch.nn.GRUCell + Linear, with the same
    mixed-precision discipline as the kernel (bf16 matmul operands, f32 state)."""
    H = h0.shape[-1]
    bf16 = jnp.bfloat16
    wih_t = w_ih.T.astype(bf16)
    whh_t = w_hh.T.astype(bf16)
    wout_t = w_out.T.astype(bf16)

    def cell(h, x_t):
        gi = jnp.dot(x_t.astype(bf16), wih_t, preferred_element_type=jnp.float32) + b_ih
        gh = jnp.dot(h.astype(bf16), whh_t, preferred_element_type=jnp.float32) + b_hh
        r = jax.nn.sigmoid(gi[:, :H] + gh[:, :H])
        z = jax.nn.sigmoid(gi[:, H:2 * H] + gh[:, H:2 * H])
        n = jnp.tanh(gi[:, 2 * H:] + r * gh[:, 2 * H:])
        h_new = (1.0 - z) * n + z * h
        return h_new, None

    h, _ = jax.lax.scan(cell, h0, jnp.transpose(x, (1, 0, 2)))
    # torch.flip(x, dims=[1]) in the original forward is discarded -> no-op.
    y = jnp.dot(h.astype(bf16), wout_t, preferred_element_type=jnp.float32) + b_out
    return y, h


if __name__ == "__main__":
    N, L, D, H = 2, 8, 16, 32   # batch, seq, input_size, hidden_size

    key = jax.random.PRNGKey(0)
    ks = jax.random.split(key, 8)
    bound_c = 1.0 / jnp.sqrt(H)   # GRUCell init range (PyTorch default)
    bound_l = 1.0 / jnp.sqrt(H)   # Linear init range (fan_in = hidden_size)

    w_ih = jax.random.uniform(ks[0], (3 * H, D), jnp.float32, -bound_c, bound_c)
    w_hh = jax.random.uniform(ks[1], (3 * H, H), jnp.float32, -bound_c, bound_c)
    b_ih = jax.random.uniform(ks[2], (3 * H,), jnp.float32, -bound_c, bound_c)
    b_hh = jax.random.uniform(ks[3], (3 * H,), jnp.float32, -bound_c, bound_c)
    w_out = jax.random.uniform(ks[4], (D, H), jnp.float32, -bound_l, bound_l)
    b_out = jax.random.uniform(ks[5], (D,), jnp.float32, -bound_l, bound_l)

    x = jax.random.normal(ks[6], (N, L, D), jnp.float32)
    h0 = jnp.zeros((N, H), jnp.float32)   # forward(x, h=None) path

    y, h = many_to_one_gru(x, h0, w_ih, w_hh, b_ih, b_hh, w_out, b_out)
    jax.block_until_ready((y, h))

    y_ref, h_ref = _reference(x, h0, w_ih, w_hh, b_ih, b_hh, w_out, b_out)
    assert jnp.allclose(y, y_ref, atol=2e-3, rtol=2e-3), "y mismatch vs reference"
    assert jnp.allclose(h, h_ref, atol=2e-3, rtol=2e-3), "h mismatch vs reference"

    print("KERNEL_OK")
</pallas_src>

<mosaic_0001>
module attributes {stable_mosaic.version = 11 : i64} {
  func.func @gru_kernel(%arg0: i32, %arg1: i32, %arg2: memref<8x8x128xbf16, #tpu.memory_space<vmem>>, %arg3: memref<8x128xf32, #tpu.memory_space<vmem>>, %arg4: memref<128x384xbf16, #tpu.memory_space<vmem>>, %arg5: memref<128x384xbf16, #tpu.memory_space<vmem>>, %arg6: memref<1x384xf32, #tpu.memory_space<vmem>>, %arg7: memref<1x128xf32, #tpu.memory_space<vmem>>, %arg8: memref<8x128xf32, #tpu.memory_space<vmem>>, %arg9: memref<8x8x384xf32, #tpu.memory_space<vmem>>) attributes {dimension_semantics = [#tpu.dimension_semantics<parallel>, #tpu.dimension_semantics<arbitrary>], iteration_bounds = array<i64: 1, 1>, scalar_prefetch = 0 : i64, scratch_operands = 1 : i64, tpu.core_type = #tpu.core_type<tc>, window_params = [{transform_indices = @transform_0, window_bounds = array<i64: 8, 8, 128>}, {transform_indices = @transform_1, window_bounds = array<i64: 8, 128>}, {pipeline_mode = #tpu.pipeline_mode<synchronous>, transform_indices = @transform_2, window_bounds = array<i64: 128, 384>}, {pipeline_mode = #tpu.pipeline_mode<synchronous>, transform_indices = @transform_3, window_bounds = array<i64: 128, 384>}, {pipeline_mode = #tpu.pipeline_mode<synchronous>, transform_indices = @transform_4, window_bounds = array<i64: 1, 384>}, {pipeline_mode = #tpu.pipeline_mode<synchronous>, transform_indices = @transform_5, window_bounds = array<i64: 1, 128>}, {transform_indices = @transform_6, window_bounds = array<i64: 8, 128>}]} {
    %c0_i32 = arith.constant 0 : i32
    %0 = arith.cmpi eq, %arg1, %c0_i32 : i32
    %1 = arith.extui %0 : i1 to i32
    %c0_i32_0 = arith.constant 0 : i32
    %2 = arith.cmpi ne, %1, %c0_i32_0 : i32
    scf.if %2 {
      %c0_91 = arith.constant 0 : index
      %c0_92 = arith.constant 0 : index
      %290 = vector.load %arg3[%c0_91, %c0_92] : memref<8x128xf32, #tpu.memory_space<vmem>>, vector<8x128xf32>
      %c0_93 = arith.constant 0 : index
      %c0_94 = arith.constant 0 : index
      %291 = vector.load %arg8[%c0_93, %c0_94] : memref<8x128xf32, #tpu.memory_space<vmem>>, vector<8x128xf32>
      tpu.vector_store %arg8[%c0_93, %c0_94], %290 {strides = array<i32>} : memref<8x128xf32, #tpu.memory_space<vmem>>, vector<8x128xf32>,
    } else {
    }
    %c0 = arith.constant 0 : index
    %c0_1 = arith.constant 0 : index
    %c0_2 = arith.constant 0 : index
    %3 = vector.load %arg2[%c0, %c0_1, %c0_2] : memref<8x8x128xbf16, #tpu.memory_space<vmem>>, vector<8x8x128xbf16>
    %4 = vector.shape_cast %3 : vector<8x8x128xbf16> to vector<64x128xbf16>
    %c0_3 = arith.constant 0 : index
    %c0_4 = arith.constant 0 : index
    %5 = vector.load %arg4[%c0_3, %c0_4] : memref<128x384xbf16, #tpu.memory_space<vmem>>, vector<128x384xbf16>
    %cst = arith.constant dense<0.000000e+00> : vector<64x384xf32>
    %6 = tpu.matmul %4, %5, %cst {dimension_numbers = #tpu.dot_dimension_numbers<[1], [0], [0], [1], [0, 0, 1, 1], [], []>} : vector<64x128xbf16>, vector<128x384xbf16>, vector<64x384xf32> -> vector<64x384xf32>
    %c0_5 = arith.constant 0 : index
    %c0_6 = arith.constant 0 : index
    %7 = vector.load %arg6[%c0_5, %c0_6] : memref<1x384xf32, #tpu.memory_space<vmem>>, vector<1x384xf32>
    %8 = vector.broadcast %7 : vector<1x384xf32> to vector<64x384xf32>
    %9 = arith.addf %6, %8 : vector<64x384xf32>
    %10 = vector.shape_cast %9 : vector<64x384xf32> to vector<8x8x384xf32>
    %c0_7 = arith.constant 0 : index
    %c0_8 = arith.constant 0 : index
    %c0_9 = arith.constant 0 : index
    %11 = vector.load %arg9[%c0_7, %c0_8, %c0_9] : memref<8x8x384xf32, #tpu.memory_space<vmem>>, vector<8x8x384xf32>
    tpu.vector_store %arg9[%c0_7, %c0_8, %c0_9], %10 {strides = array<i32>} : memref<8x8x384xf32, #tpu.memory_space<vmem>>, vector<8x8x384xf32>,
    %c0_10 = arith.constant 0 : index
    %c0_11 = arith.constant 0 : index
    %12 = vector.load %arg5[%c0_10, %c0_11] : memref<128x384xbf16, #tpu.memory_space<vmem>>, vector<128x384xbf16>
    %c0_12 = arith.constant 0 : index
    %c0_13 = arith.constant 0 : index
    %13 = vector.load %arg7[%c0_12, %c0_13] : memref<1x128xf32, #tpu.memory_space<vmem>>, vector<1x128xf32>
    %14 = vector.shape_cast %13 : vector<1x128xf32> to vector<1x128xf32>
    %15 = vector.broadcast %14 : vector<1x128xf32> to vector<8x128xf32>
    %c0_14 = arith.constant 0 : index
    %c0_15 = arith.constant 0 : index
    %16 = vector.load %arg8[%c0_14, %c0_15] : memref<8x128xf32, #tpu.memory_space<vmem>>, vector<8x128xf32>
    %c0_i32_16 = arith.constant 0 : i32
    %17 = arith.index_cast %c0_i32_16 : i32 to index
    %c0_17 = arith.constant 0 : index
    %c0_18 = arith.constant 0 : index
    %18 = vector.load %arg9[%17, %c0_17, %c0_18] : memref<8x8x384xf32, #tpu.memory_space<vmem>>, vector<1x8x384xf32>
    %19 = vector.shape_cast %18 : vector<1x8x384xf32> to vector<8x384xf32>
    %20 = arith.truncf %16 : vector<8x128xf32> to vector<8x128xbf16>
    %cst_19 = arith.constant dense<0.000000e+00> : vector<8x384xf32>
    %21 = tpu.matmul %20, %12, %cst_19 {dimension_numbers = #tpu.dot_dimension_numbers<[1], [0], [0], [1], [0, 0, 1, 1], [], []>} : vector<8x128xbf16>, vector<128x384xbf16>, vector<8x384xf32> -> vector<8x384xf32>
    %22 = vector.extract_strided_slice %19 {offsets = [0, 0], sizes = [8, 128], strides = [1, 1]} : vector<8x384xf32> to vector<8x128xf32>
    %23 = vector.extract_strided_slice %21 {offsets = [0, 0], sizes = [8, 128], strides = [1, 1]} : vector<8x384xf32> to vector<8x128xf32>
    %24 = arith.addf %22, %23 : vector<8x128xf32>
    %25 = vector.extract_strided_slice %19 {offsets = [0, 128], sizes = [8, 128], strides = [1, 1]} : vector<8x384xf32> to vector<8x128xf32>
    %26 = vector.extract_strided_slice %21 {offsets = [0, 128], sizes = [8, 128], strides = [1, 1]} : vector<8x384xf32> to vector<8x128xf32>
    %27 = arith.addf %25, %26 : vector<8x128xf32>
    %cst_20 = arith.constant 5.000000e-01 : f32
    %28 = vector.broadcast %cst_20 : f32 to vector<8x128xf32>
    %29 = arith.mulf %28, %24 : vector<8x128xf32>
    %30 = math.tanh %29 : vector<8x128xf32>
    %cst_21 = arith.constant 5.000000e-01 : f32
    %31 = vector.broadcast %cst_21 : f32 to vector<8x128xf32>
    %32 = arith.mulf %31, %30 : vector<8x128xf32>
    %cst_22 = arith.constant 5.000000e-01 : f32
    %33 = vector.broadcast %cst_22 : f32 to vector<8x128xf32>
    %34 = arith.addf %32, %33 : vector<8x128xf32>
    %cst_23 = arith.constant 5.000000e-01 : f32
    %35 = vector.broadcast %cst_23 : f32 to vector<8x128xf32>
    %36 = arith.mulf %35, %27 : vector<8x128xf32>
    %37 = math.tanh %36 : vector<8x128xf32>
    %cst_24 = arith.constant 5.000000e-01 : f32
    %38 = vector.broadcast %cst_24 : f32 to vector<8x128xf32>
    %39 = arith.mulf %38, %37 : vector<8x128xf32>
    %cst_25 = arith.constant 5.000000e-01 : f32
    %40 = vector.broadcast %cst_25 : f32 to vector<8x128xf32>
    %41 = arith.addf %39, %40 : vector<8x128xf32>
    %42 = vector.extract_strided_slice %19 {offsets = [0, 256], sizes = [8, 128], strides = [1, 1]} : vector<8x384xf32> to vector<8x128xf32>
    %43 = vector.extract_strided_slice %21 {offsets = [0, 256], sizes = [8, 128], strides = [1, 1]} : vector<8x384xf32> to vector<8x128xf32>
    %44 = arith.addf %43, %15 : vector<8x128xf32>
    %45 = arith.mulf %34, %44 : vector<8x128xf32>
    %46 = arith.addf %42, %45 : vector<8x128xf32>
    %47 = math.tanh %46 : vector<8x128xf32>
    %48 = arith.subf %16, %47 : vector<8x128xf32>
    %49 = arith.mulf %41, %48 : vector<8x128xf32>
    %50 = arith.addf %47, %49 : vector<8x128xf32>
    %c1_i32 = arith.constant 1 : i32
    %51 = arith.index_cast %c1_i32 : i32 to index
    %c0_26 = arith.constant 0 : index
    %c0_27 = arith.constant 0 : index
    %52 = vector.load %arg9[%51, %c0_26, %c0_27] : memref<8x8x384xf32, #tpu.memory_space<vmem>>, vector<1x8x384xf32>
    %53 = vector.shape_cast %52 : vector<1x8x384xf32> to vector<8x384xf32>
    %54 = arith.truncf %50 : vector<8x128xf32> to vector<8x128xbf16>
    %cst_28 = arith.constant dense<0.000000e+00> : vector<8x384xf32>
    %55 = tpu.matmul %54, %12, %cst_28 {dimension_numbers = #tpu.dot_dimension_numbers<[1], [0], [0], [1], [0, 0, 1, 1], [], []>} : vector<8x128xbf16>, vector<128x384xbf16>, vector<8x384xf32> -> vector<8x384xf32>
    %56 = vector.extract_strided_slice %53 {offsets = [0, 0], sizes = [8, 128], strides = [1, 1]} : vector<8x384xf32> to vector<8x128xf32>
    %57 = vector.extract_strided_slice %55 {offsets = [0, 0], sizes = [8, 128], strides = [1, 1]} : vector<8x384xf32> to vector<8x128xf32>
    %58 = arith.addf %56, %57 : vector<8x128xf32>
    %59 = vector.extract_strided_slice %53 {offsets = [0, 128], sizes = [8, 128], strides = [1, 1]} : vector<8x384xf32> to vector<8x128xf32>
    %60 = vector.extract_strided_slice %55 {offsets = [0, 128], sizes = [8, 128], strides = [1, 1]} : vector<8x384xf32> to vector<8x128xf32>
    %61 = arith.addf %59, %60 : vector<8x128xf32>
    %cst_29 = arith.constant 5.000000e-01 : f32
    %62 = vector.broadcast %cst_29 : f32 to vector<8x128xf32>
    %63 = arith.mulf %62, %58 : vector<8x128xf32>
    %64 = math.tanh %63 : vector<8x128xf32>
    %cst_30 = arith.constant 5.000000e-01 : f32
    %65 = vector.broadcast %cst_30 : f32 to vector<8x128xf32>
    %66 = arith.mulf %65, %64 : vector<8x128xf32>
    %cst_31 = arith.constant 5.000000e-01 : f32
    %67 = vector.broadcast %cst_31 : f32 to vector<8x128xf32>
    %68 = arith.addf %66, %67 : vector<8x128xf32>
    %cst_32 = arith.constant 5.000000e-01 : f32
    %69 = vector.broadcast %cst_32 : f32 to vector<8x128xf32>
    %70 = arith.mulf %69, %61 : vector<8x128xf32>
    %71 = math.tanh %70 : vector<8x128xf32>
    %cst_33 = arith.constant 5.000000e-01 : f32
    %72 = vector.broadcast %cst_33 : f32 to vector<8x128xf32>
    %73 = arith.mulf %72, %71 : vector<8x128xf32>
    %cst_34 = arith.constant 5.000000e-01 : f32
    %74 = vector.broadcast %cst_34 : f32 to vector<8x128xf32>
    %75 = arith.addf %73, %74 : vector<8x128xf32>
    %76 = vector.extract_strided_slice %53 {offsets = [0, 256], sizes = [8, 128], strides = [1, 1]} : vector<8x384xf32> to vector<8x128xf32>
    %77 = vector.extract_strided_slice %55 {offsets = [0, 256], sizes = [8, 128], strides = [1, 1]} : vector<8x384xf32> to vector<8x128xf32>
    %78 = arith.addf %77, %15 : vector<8x128xf32>
    %79 = arith.mulf %68, %78 : vector<8x128xf32>
    %80 = arith.addf %76, %79 : vector<8x128xf32>
    %81 = math.tanh %80 : vector<8x128xf32>
    %82 = arith.subf %50, %81 : vector<8x128xf32>
    %83 = arith.mulf %75, %82 : vector<8x128xf32>
    %84 = arith.addf %81, %83 : vector<8x128xf32>
    %c2_i32 = arith.constant 2 : i32
    %85 = arith.index_cast %c2_i32 : i32 to index
    %c0_35 = arith.constant 0 : index
    %c0_36 = arith.constant 0 : index
    %86 = vector.load %arg9[%85, %c0_35, %c0_36] : memref<8x8x384xf32, #tpu.memory_space<vmem>>, vector<1x8x384xf32>
    %87 = vector.shape_cast %86 : vector<1x8x384xf32> to vector<8x384xf32>
    %88 = arith.truncf %84 : vector<8x128xf32> to vector<8x128xbf16>
    %cst_37 = arith.constant dense<0.000000e+00> : vector<8x384xf32>
    %89 = tpu.matmul %88, %12, %cst_37 {dimension_numbers = #tpu.dot_dimension_numbers<[1], [0], [0], [1], [0, 0, 1, 1], [], []>} : vector<8x128xbf16>, vector<128x384xbf16>, vector<8x384xf32> -> vector<8x384xf32>
    %90 = vector.extract_strided_slice %87 {offsets = [0, 0], sizes = [8, 128], strides = [1, 1]} : vector<8x384xf32> to vector<8x128xf32>
    %91 = vector.extract_strided_slice %89 {offsets = [0, 0], sizes = [8, 128], strides = [1, 1]} : vector<8x384xf32> to vector<8x128xf32>
    %92 = arith.addf %90, %91 : vector<8x128xf32>
    %93 = vector.extract_strided_slice %87 {offsets = [0, 128], sizes = [8, 128], strides = [1, 1]} : vector<8x384xf32> to vector<8x128xf32>
    %94 = vector.extract_strided_slice %89 {offsets = [0, 128], sizes = [8, 128], strides = [1, 1]} : vector<8x384xf32> to vector<8x128xf32>
    %95 = arith.addf %93, %94 : vector<8x128xf32>
    %cst_38 = arith.constant 5.000000e-01 : f32
    %96 = vector.broadcast %cst_38 : f32 to vector<8x128xf32>
    %97 = arith.mulf %96, %92 : vector<8x128xf32>
    %98 = math.tanh %97 : vector<8x128xf32>
    %cst_39 = arith.constant 5.000000e-01 : f32
    %99 = vector.broadcast %cst_39 : f32 to vector<8x128xf32>
    %100 = arith.mulf %99, %98 : vector<8x128xf32>
    %cst_40 = arith.constant 5.000000e-01 : f32
    %101 = vector.broadcast %cst_40 : f32 to vector<8x128xf32>
    %102 = arith.addf %100, %101 : vector<8x128xf32>
    %cst_41 = arith.constant 5.000000e-01 : f32
    %103 = vector.broadcast %cst_41 : f32 to vector<8x128xf32>
    %104 = arith.mulf %103, %95 : vector<8x128xf32>
    %105 = math.tanh %104 : vector<8x128xf32>
    %cst_42 = arith.constant 5.000000e-01 : f32
    %106 = vector.broadcast %cst_42 : f32 to vector<8x128xf32>
    %107 = arith.mulf %106, %105 : vector<8x128xf32>
    %cst_43 = arith.constant 5.000000e-01 : f32
    %108 = vector.broadcast %cst_43 : f32 to vector<8x128xf32>
    %109 = arith.addf %107, %108 : vector<8x128xf32>
    %110 = vector.extract_strided_slice %87 {offsets = [0, 256], sizes = [8, 128], strides = [1, 1]} : vector<8x384xf32> to vector<8x128xf32>
    %111 = vector.extract_strided_slice %89 {offsets = [0, 256], sizes = [8, 128], strides = [1, 1]} : vector<8x384xf32> to vector<8x128xf32>
    %112 = arith.addf %111, %15 : vector<8x128xf32>
    %113 = arith.mulf %102, %112 : vector<8x128xf32>
    %114 = arith.addf %110, %113 : vector<8x128xf32>
    %115 = math.tanh %114 : vector<8x128xf32>
    %116 = arith.subf %84, %115 : vector<8x128xf32>
    %117 = arith.mulf %109, %116 : vector<8x128xf32>
    %118 = arith.addf %115, %117 : vector<8x128xf32>
    %c3_i32 = arith.constant 3 : i32
    %119 = arith.index_cast %c3_i32 : i32 to index
    %c0_44 = arith.constant 0 : index
    %c0_45 = arith.constant 0 : index
    %120 = vector.load %arg9[%119, %c0_44, %c0_45] : memref<8x8x384xf32, #tpu.memory_space<vmem>>, vector<1x8x384xf32>
    %121 = vector.shape_cast %120 : vector<1x8x384xf32> to vector<8x384xf32>
    %122 = arith.truncf %118 : vector<8x128xf32> to vector<8x128xbf16>
    %cst_46 = arith.constant dense<0.000000e+00> : vector<8x384xf32>
    %123 = tpu.matmul %122, %12, %cst_46 {dimension_numbers = #tpu.dot_dimension_numbers<[1], [0], [0], [1], [0, 0, 1, 1], [], []>} : vector<8x128xbf16>, vector<128x384xbf16>, vector<8x384xf32> -> vector<8x384xf32>
    %124 = vector.extract_strided_slice %121 {offsets = [0, 0], sizes = [8, 128], strides = [1, 1]} : vector<8x384xf32> to vector<8x128xf32>
    %125 = vector.extract_strided_slice %123 {offsets = [0, 0], sizes = [8, 128], strides = [1, 1]} : vector<8x384xf32> to vector<8x128xf32>
    %126 = arith.addf %124, %125 : vector<8x128xf32>
    %127 = vector.extract_strided_slice %121 {offsets = [0, 128], sizes = [8, 128], strides = [1, 1]} : vector<8x384xf32> to vector<8x128xf32>
    %128 = vector.extract_strided_slice %123 {offsets = [0, 128], sizes = [8, 128], strides = [1, 1]} : vector<8x384xf32> to vector<8x128xf32>
    %129 = arith.addf %127, %128 : vector<8x128xf32>
    %cst_47 = arith.constant 5.000000e-01 : f32
    %130 = vector.broadcast %cst_47 : f32 to vector<8x128xf32>
    %131 = arith.mulf %130, %126 : vector<8x128xf32>
    %132 = math.tanh %131 : vector<8x128xf32>
    %cst_48 = arith.constant 5.000000e-01 : f32
    %133 = vector.broadcast %cst_48 : f32 to vector<8x128xf32>
    %134 = arith.mulf %133, %132 : vector<8x128xf32>
    %cst_49 = arith.constant 5.000000e-01 : f32
    %135 = vector.broadcast %cst_49 : f32 to vector<8x128xf32>
    %136 = arith.addf %134, %135 : vector<8x128xf32>
    %cst_50 = arith.constant 5.000000e-01 : f32
    %137 = vector.broadcast %cst_50 : f32 to vector<8x128xf32>
    %138 = arith.mulf %137, %129 : vector<8x128xf32>
    %139 = math.tanh %138 : vector<8x128xf32>
    %cst_51 = arith.constant 5.000000e-01 : f32
    %140 = vector.broadcast %cst_51 : f32 to vector<8x128xf32>
    %141 = arith.mulf %140, %139 : vector<8x128xf32>
    %cst_52 = arith.constant 5.000000e-01 : f32
    %142 = vector.broadcast %cst_52 : f32 to vector<8x128xf32>
    %143 = arith.addf %141, %142 : vector<8x128xf32>
    %144 = vector.extract_strided_slice %121 {offsets = [0, 256], sizes = [8, 128], strides = [1, 1]} : vector<8x384xf32> to vector<8x128xf32>
    %145 = vector.extract_strided_slice %123 {offsets = [0, 256], sizes = [8, 128], strides = [1, 1]} : vector<8x384xf32> to vector<8x128xf32>
    %146 = arith.addf %145, %15 : vector<8x128xf32>
    %147 = arith.mulf %136, %146 : vector<8x128xf32>
    %148 = arith.addf %144, %147 : vector<8x128xf32>
    %149 = math.tanh %148 : vector<8x128xf32>
    %150 = arith.subf %118, %149 : vector<8x128xf32>
    %151 = arith.mulf %143, %150 : vector<8x128xf32>
    %152 = arith.addf %149, %151 : vector<8x128xf32>
    %c4_i32 = arith.constant 4 : i32
    %153 = arith.index_cast %c4_i32 : i32 to index
    %c0_53 = arith.constant 0 : index
    %c0_54 = arith.constant 0 : index
    %154 = vector.load %arg9[%153, %c0_53, %c0_54] : memref<8x8x384xf32, #tpu.memory_space<vmem>>, vector<1x8x384xf32>
    %155 = vector.shape_cast %154 : vector<1x8x384xf32> to vector<8x384xf32>
    %156 = arith.truncf %152 : vector<8x128xf32> to vector<8x128xbf16>
    %cst_55 = arith.constant dense<0.000000e+00> : vector<8x384xf32>
    %157 = tpu.matmul %156, %12, %cst_55 {dimension_numbers = #tpu.dot_dimension_numbers<[1], [0], [0], [1], [0, 0, 1, 1], [], []>} : vector<8x128xbf16>, vector<128x384xbf16>, vector<8x384xf32> -> vector<8x384xf32>
    %158 = vector.extract_strided_slice %155 {offsets = [0, 0], sizes = [8, 128], strides = [1, 1]} : vector<8x384xf32> to vector<8x128xf32>
    %159 = vector.extract_strided_slice %157 {offsets = [0, 0], sizes = [8, 128], strides = [1, 1]} : vector<8x384xf32> to vector<8x128xf32>
    %160 = arith.addf %158, %159 : vector<8x128xf32>
    %161 = vector.extract_strided_slice %155 {offsets = [0, 128], sizes = [8, 128], strides = [1, 1]} : vector<8x384xf32> to vector<8x128xf32>
    %162 = vector.extract_strided_slice %157 {offsets = [0, 128], sizes = [8, 128], strides = [1, 1]} : vector<8x384xf32> to vector<8x128xf32>
    %163 = arith.addf %161, %162 : vector<8x128xf32>
    %cst_56 = arith.constant 5.000000e-01 : f32
    %164 = vector.broadcast %cst_56 : f32 to vector<8x128xf32>
    %165 = arith.mulf %164, %160 : vector<8x128xf32>
    %166 = math.tanh %165 : vector<8x128xf32>
    %cst_57 = arith.constant 5.000000e-01 : f32
    %167 = vector.broadcast %cst_57 : f32 to vector<8x128xf32>
    %168 = arith.mulf %167, %166 : vector<8x128xf32>
    %cst_58 = arith.constant 5.000000e-01 : f32
    %169 = vector.broadcast %cst_58 : f32 to vector<8x128xf32>
    %170 = arith.addf %168, %169 : vector<8x128xf32>
    %cst_59 = arith.constant 5.000000e-01 : f32
    %171 = vector.broadcast %cst_59 : f32 to vector<8x128xf32>
    %172 = arith.mulf %171, %163 : vector<8x128xf32>
    %173 = math.tanh %172 : vector<8x128xf32>
    %cst_60 = arith.constant 5.000000e-01 : f32
    %174 = vector.broadcast %cst_60 : f32 to vector<8x128xf32>
    %175 = arith.mulf %174, %173 : vector<8x128xf32>
    %cst_61 = arith.constant 5.000000e-01 : f32
    %176 = vector.broadcast %cst_61 : f32 to vector<8x128xf32>
    %177 = arith.addf %175, %176 : vector<8x128xf32>
    %178 = vector.extract_strided_slice %155 {offsets = [0, 256], sizes = [8, 128], strides = [1, 1]} : vector<8x384xf32> to vector<8x128xf32>
    %179 = vector.extract_strided_slice %157 {offsets = [0, 256], sizes = [8, 128], strides = [1, 1]} : vector<8x384xf32> to vector<8x128xf32>
    %180 = arith.addf %179, %15 : vector<8x128xf32>
    %181 = arith.mulf %170, %180 : vector<8x128xf32>
    %182 = arith.addf %178, %181 : vector<8x128xf32>
    %183 = math.tanh %182 : vector<8x128xf32>
    %184 = arith.subf %152, %183 : vector<8x128xf32>
    %185 = arith.mulf %177, %184 : vector<8x128xf32>
    %186 = arith.addf %183, %185 : vector<8x128xf32>
    %c5_i32 = arith.constant 5 : i32
    %187 = arith.index_cast %c5_i32 : i32 to index
    %c0_62 = arith.constant 0 : index
    %c0_63 = arith.constant 0 : index
    %188 = vector.load %arg9[%187, %c0_62, %c0_63] : memref<8x8x384xf32, #tpu.memory_space<vmem>>, vector<1x8x384xf32>
    %189 = vector.shape_cast %188 : vector<1x8x384xf32> to vector<8x384xf32>
    %190 = arith.truncf %186 : vector<8x128xf32> to vector<8x128xbf16>
    %cst_64 = arith.constant dense<0.000000e+00> : vector<8x384xf32>
    %191 = tpu.matmul %190, %12, %cst_64 {dimension_numbers = #tpu.dot_dimension_numbers<[1], [0], [0], [1], [0, 0, 1, 1], [], []>} : vector<8x128xbf16>, vector<128x384xbf16>, vector<8x384xf32> -> vector<8x384xf32>
    %192 = vector.extract_strided_slice %189 {offsets = [0, 0], sizes = [8, 128], strides = [1, 1]} : vector<8x384xf32> to vector<8x128xf32>
    %193 = vector.extract_strided_slice %191 {offsets = [0, 0], sizes = [8, 128], strides = [1, 1]} : vector<8x384xf32> to vector<8x128xf32>
    %194 = arith.addf %192, %193 : vector<8x128xf32>
    %195 = vector.extract_strided_slice %189 {offsets = [0, 128], sizes = [8, 128], strides = [1, 1]} : vector<8x384xf32> to vector<8x128xf32>
    %196 = vector.extract_strided_slice %191 {offsets = [0, 128], sizes = [8, 128], strides = [1, 1]} : vector<8x384xf32> to vector<8x128xf32>
    %197 = arith.addf %195, %196 : vector<8x128xf32>
    %cst_65 = arith.constant 5.000000e-01 : f32
    %198 = vector.broadcast %cst_65 : f32 to vector<8x128xf32>
    %199 = arith.mulf %198, %194 : vector<8x128xf32>
    %200 = math.tanh %199 : vector<8x128xf32>
    %cst_66 = arith.constant 5.000000e-01 : f32
    %201 = vector.broadcast %cst_66 : f32 to vector<8x128xf32>
    %202 = arith.mulf %201, %200 : vector<8x128xf32>
    %cst_67 = arith.constant 5.000000e-01 : f32
    %203 = vector.broadcast %cst_67 : f32 to vector<8x128xf32>
    %204 = arith.addf %202, %203 : vector<8x128xf32>
    %cst_68 = arith.constant 5.000000e-01 : f32
    %205 = vector.broadcast %cst_68 : f32 to vector<8x128xf32>
    %206 = arith.mulf %205, %197 : vector<8x128xf32>
    %207 = math.tanh %206 : vector<8x128xf32>
    %cst_69 = arith.constant 5.000000e-01 : f32
    %208 = vector.broadcast %cst_69 : f32 to vector<8x128xf32>
    %209 = arith.mulf %208, %207 : vector<8x128xf32>
    %cst_70 = arith.constant 5.000000e-01 : f32
    %210 = vector.broadcast %cst_70 : f32 to vector<8x128xf32>
    %211 = arith.addf %209, %210 : vector<8x128xf32>
    %212 = vector.extract_strided_slice %189 {offsets = [0, 256], sizes = [8, 128], strides = [1, 1]} : vector<8x384xf32> to vector<8x128xf32>
    %213 = vector.extract_strided_slice %191 {offsets = [0, 256], sizes = [8, 128], strides = [1, 1]} : vector<8x384xf32> to vector<8x128xf32>
    %214 = arith.addf %213, %15 : vector<8x128xf32>
    %215 = arith.mulf %204, %214 : vector<8x128xf32>
    %216 = arith.addf %212, %215 : vector<8x128xf32>
    %217 = math.tanh %216 : vector<8x128xf32>
    %218 = arith.subf %186, %217 : vector<8x128xf32>
    %219 = arith.mulf %211, %218 : vector<8x128xf32>
    %220 = arith.addf %217, %219 : vector<8x128xf32>
    %c6_i32 = arith.constant 6 : i32
    %221 = arith.index_cast %c6_i32 : i32 to index
    %c0_71 = arith.constant 0 : index
    %c0_72 = arith.constant 0 : index
    %222 = vector.load %arg9[%221, %c0_71, %c0_72] : memref<8x8x384xf32, #tpu.memory_space<vmem>>, vector<1x8x384xf32>
    %223 = vector.shape_cast %222 : vector<1x8x384xf32> to vector<8x384xf32>
    %224 = arith.truncf %220 : vector<8x128xf32> to vector<8x128xbf16>
    %cst_73 = arith.constant dense<0.000000e+00> : vector<8x384xf32>
    %225 = tpu.matmul %224, %12, %cst_73 {dimension_numbers = #tpu.dot_dimension_numbers<[1], [0], [0], [1], [0, 0, 1, 1], [], []>} : vector<8x128xbf16>, vector<128x384xbf16>, vector<8x384xf32> -> vector<8x384xf32>
    %226 = vector.extract_strided_slice %223 {offsets = [0, 0], sizes = [8, 128], strides = [1, 1]} : vector<8x384xf32> to vector<8x128xf32>
    %227 = vector.extract_strided_slice %225 {offsets = [0, 0], sizes = [8, 128], strides = [1, 1]} : vector<8x384xf32> to vector<8x128xf32>
    %228 = arith.addf %226, %227 : vector<8x128xf32>
    %229 = vector.extract_strided_slice %223 {offsets = [0, 128], sizes = [8, 128], strides = [1, 1]} : vector<8x384xf32> to vector<8x128xf32>
    %230 = vector.extract_strided_slice %225 {offsets = [0, 128], sizes = [8, 128], strides = [1, 1]} : vector<8x384xf32> to vector<8x128xf32>
    %231 = arith.addf %229, %230 : vector<8x128xf32>
    %cst_74 = arith.constant 5.000000e-01 : f32
    %232 = vector.broadcast %cst_74 : f32 to vector<8x128xf32>
    %233 = arith.mulf %232, %228 : vector<8x128xf32>
    %234 = math.tanh %233 : vector<8x128xf32>
    %cst_75 = arith.constant 5.000000e-01 : f32
    %235 = vector.broadcast %cst_75 : f32 to vector<8x128xf32>
    %236 = arith.mulf %235, %234 : vector<8x128xf32>
    %cst_76 = arith.constant 5.000000e-01 : f32
    %237 = vector.broadcast %cst_76 : f32 to vector<8x128xf32>
    %238 = arith.addf %236, %237 : vector<8x128xf32>
    %cst_77 = arith.constant 5.000000e-01 : f32
    %239 = vector.broadcast %cst_77 : f32 to vector<8x128xf32>
    %240 = arith.mulf %239, %231 : vector<8x128xf32>
    %241 = math.tanh %240 : vector<8x128xf32>
    %cst_78 = arith.constant 5.000000e-01 : f32
    %242 = vector.broadcast %cst_78 : f32 to vector<8x128xf32>
    %243 = arith.mulf %242, %241 : vector<8x128xf32>
    %cst_79 = arith.constant 5.000000e-01 : f32
    %244 = vector.broadcast %cst_79 : f32 to vector<8x128xf32>
    %245 = arith.addf %243, %244 : vector<8x128xf32>
    %246 = vector.extract_strided_slice %223 {offsets = [0, 256], sizes = [8, 128], strides = [1, 1]} : vector<8x384xf32> to vector<8x128xf32>
    %247 = vector.extract_strided_slice %225 {offsets = [0, 256], sizes = [8, 128], strides = [1, 1]} : vector<8x384xf32> to vector<8x128xf32>
    %248 = arith.addf %247, %15 : vector<8x128xf32>
    %249 = arith.mulf %238, %248 : vector<8x128xf32>
    %250 = arith.addf %246, %249 : vector<8x128xf32>
    %251 = math.tanh %250 : vector<8x128xf32>
    %252 = arith.subf %220, %251 : vector<8x128xf32>
    %253 = arith.mulf %245, %252 : vector<8x128xf32>
    %254 = arith.addf %251, %253 : vector<8x128xf32>
    %c7_i32 = arith.constant 7 : i32
    %255 = arith.index_cast %c7_i32 : i32 to index
    %c0_80 = arith.constant 0 : index
    %c0_81 = arith.constant 0 : index
    %256 = vector.load %arg9[%255, %c0_80, %c0_81] : memref<8x8x384xf32, #tpu.memory_space<vmem>>, vector<1x8x384xf32>
    %257 = vector.shape_cast %256 : vector<1x8x384xf32> to vector<8x384xf32>
    %258 = arith.truncf %254 : vector<8x128xf32> to vector<8x128xbf16>
    %cst_82 = arith.constant dense<0.000000e+00> : vector<8x384xf32>
    %259 = tpu.matmul %258, %12, %cst_82 {dimension_numbers = #tpu.dot_dimension_numbers<[1], [0], [0], [1], [0, 0, 1, 1], [], []>} : vector<8x128xbf16>, vector<128x384xbf16>, vector<8x384xf32> -> vector<8x384xf32>
    %260 = vector.extract_strided_slice %257 {offsets = [0, 0], sizes = [8, 128], strides = [1, 1]} : vector<8x384xf32> to vector<8x128xf32>
    %261 = vector.extract_strided_slice %259 {offsets = [0, 0], sizes = [8, 128], strides = [1, 1]} : vector<8x384xf32> to vector<8x128xf32>
    %262 = arith.addf %260, %261 : vector<8x128xf32>
    %263 = vector.extract_strided_slice %257 {offsets = [0, 128], sizes = [8, 128], strides = [1, 1]} : vector<8x384xf32> to vector<8x128xf32>
    %264 = vector.extract_strided_slice %259 {offsets = [0, 128], sizes = [8, 128], strides = [1, 1]} : vector<8x384xf32> to vector<8x128xf32>
    %265 = arith.addf %263, %264 : vector<8x128xf32>
    %cst_83 = arith.constant 5.000000e-01 : f32
    %266 = vector.broadcast %cst_83 : f32 to vector<8x128xf32>
    %267 = arith.mulf %266, %262 : vector<8x128xf32>
    %268 = math.tanh %267 : vector<8x128xf32>
    %cst_84 = arith.constant 5.000000e-01 : f32
    %269 = vector.broadcast %cst_84 : f32 to vector<8x128xf32>
    %270 = arith.mulf %269, %268 : vector<8x128xf32>
    %cst_85 = arith.constant 5.000000e-01 : f32
    %271 = vector.broadcast %cst_85 : f32 to vector<8x128xf32>
    %272 = arith.addf %270, %271 : vector<8x128xf32>
    %cst_86 = arith.constant 5.000000e-01 : f32
    %273 = vector.broadcast %cst_86 : f32 to vector<8x128xf32>
    %274 = arith.mulf %273, %265 : vector<8x128xf32>
    %275 = math.tanh %274 : vector<8x128xf32>
    %cst_87 = arith.constant 5.000000e-01 : f32
    %276 = vector.broadcast %cst_87 : f32 to vector<8x128xf32>
    %277 = arith.mulf %276, %275 : vector<8x128xf32>
    %cst_88 = arith.constant 5.000000e-01 : f32
    %278 = vector.broadcast %cst_88 : f32 to vector<8x128xf32>
    %279 = arith.addf %277, %278 : vector<8x128xf32>
    %280 = vector.extract_strided_slice %257 {offsets = [0, 256], sizes = [8, 128], strides = [1, 1]} : vector<8x384xf32> to vector<8x128xf32>
    %281 = vector.extract_strided_slice %259 {offsets = [0, 256], sizes = [8, 128], strides = [1, 1]} : vector<8x384xf32> to vector<8x128xf32>
    %282 = arith.addf %281, %15 : vector<8x128xf32>
    %283 = arith.mulf %272, %282 : vector<8x128xf32>
    %284 = arith.addf %280, %283 : vector<8x128xf32>
    %285 = math.tanh %284 : vector<8x128xf32>
    %286 = arith.subf %254, %285 : vector<8x128xf32>
    %287 = arith.mulf %279, %286 : vector<8x128xf32>
    %288 = arith.addf %285, %287 : vector<8x128xf32>
    %c8_i32 = arith.constant 8 : i32
    %c0_89 = arith.constant 0 : index
    %c0_90 = arith.constant 0 : index
    %289 = vector.load %arg8[%c0_89, %c0_90] : memref<8x128xf32, #tpu.memory_space<vmem>>, vector<8x128xf32>
    tpu.vector_store %arg8[%c0_89, %c0_90], %288 {strides = array<i32>} : memref<8x128xf32, #tpu.memory_space<vmem>>, vector<8x128xf32>,
    return
  }
  func.func @transform_0(%arg0: i32, %arg1: i32) -> (i32, i32, i32) {
    %c0_i32 = arith.constant 0 : i32
    %c0_i32_0 = arith.constant 0 : i32
    return %arg1, %arg0, %c0_i32 : i32, i32, i32
  }
  func.func @transform_1(%arg0: i32, %arg1: i32) -> (i32, i32) {
    %c0_i32 = arith.constant 0 : i32
    %c0_i32_0 = arith.constant 0 : i32
    return %arg0, %c0_i32 : i32, i32
  }
  func.func @transform_2(%arg0: i32, %arg1: i32) -> (i32, i32) {
    %c0_i32 = arith.constant 0 : i32
    %c0_i32_0 = arith.constant 0 : i32
    %c0_i32_1 = arith.constant 0 : i32
    return %c0_i32, %c0_i32_0 : i32, i32
  }
  func.func @transform_3(%arg0: i32, %arg1: i32) -> (i32, i32) {
    %c0_i32 = arith.constant 0 : i32
    %c0_i32_0 = arith.constant 0 : i32
    %c0_i32_1 = arith.constant 0 : i32
    return %c0_i32, %c0_i32_0 : i32, i32
  }
  func.func @transform_4(%arg0: i32, %arg1: i32) -> (i32, i32) {
    %c0_i32 = arith.constant 0 : i32
    %c0_i32_0 = arith.constant 0 : i32
    %c0_i32_1 = arith.constant 0 : i32
    return %c0_i32, %c0_i32_0 : i32, i32
  }
  func.func @transform_5(%arg0: i32, %arg1: i32) -> (i32, i32) {
    %c0_i32 = arith.constant 0 : i32
    %c0_i32_0 = arith.constant 0 : i32
    %c0_i32_1 = arith.constant 0 : i32
    return %c0_i32, %c0_i32_0 : i32, i32
  }
  func.func @transform_6(%arg0: i32, %arg1: i32) -> (i32, i32) {
    %c0_i32 = arith.constant 0 : i32
    %c0_i32_0 = arith.constant 0 : i32
    return %arg0, %c0_i32 : i32, i32
  }
}

</mosaic_0001>

<bundles_post_ra>
// kernel: tpu_custom_call.1
= control target key start
LH: loop header
LB: loop body
LE: loop exit
PB: predicated region body
PF: predicated region fallthrough
CT: control target
= control target key end

     0   :  { %11 = vsyncpa [#allocation4], 0  ;;  %s2591_s0 = inlined_call_operand.hbm [shape: bf16[8,8,128], index: 0, kind: input, shape index: {}]   ;;  %s2592_s1 = inlined_call_operand.hbm [shape: f32[8,128], index: 1, kind: input, shape index: {}]   ;;  %s2593_s2 = inlined_call_operand.hbm [shape: bf16[128,384], index: 2, kind: input, shape index: {}]   ;;  %s2594_s3 = inlined_call_operand.hbm [shape: bf16[128,384], index: 3, kind: input, shape index: {}]   ;;  %s2595_s4 = inlined_call_operand.vmem [shape: f32[1,384], index: 4, kind: input, shape index: {}]   ;;  %s2596_s5 = inlined_call_operand.vmem [shape: f32[1,128], index: 5, kind: input, shape index: {}]   ;;  %s2597_s6 = inlined_call_operand.hbm [shape: f32[8,128], index: 6, kind: output, shape index: {}]  }
   0x1   :  { %12 = vsyncpa [#allocation7], 0 }
   0x2   :  { %13 = vsyncpa [#allocation10], 0 }
   0x3   :  { %14 = vsyncpa [#allocation5], 0  ;;  %s2042_s21 = smov [#allocation6]   ;;  %s2043_s23 = smov [#allocation3]  }
   0x4   :  { %s33_s22 = sshll.u32 %s2042_s21, 4  ;;  %s20_s24 = sshll.u32 %s2043_s23, 4  ;;  %s34_s22 = int_to_ptr.vmem [resolvable:$true] %s33_s22  ;;  %s2089_s24 = int_to_ptr.vmem [resolvable:$true] %s20_s24 }
   0x5   :  { %s1924_s27 = scalar_lea.hbm %s2592_s1, 128 }
   0x6   :  { %p1925_p0 = scmp.ne.s32.totalorder %s2592_s1, %s1924_s27  ;;  %p1928_p1 = scmp.lt.u32.totalorder %s1924_s27, %s2592_s1 }
   0x8   :  { %p1930_p2 = pnand %p1928_p1, %p1925_p0 }
   0xa   :  { %1933 = shalt.err (!%p1930_p2)
}
   0xb   :  { %s1934_s8 = scalar_lea.vmem %s34_s22, 128  ;;  %p1939_p4 = scmp.lt.s32.totalorder %s34_s22, %s34_s22 }
   0xc   :  { %p1935_p3 = scmp.ne.s32.totalorder %s34_s22, %s1934_s8  ;;  %p1940_p5 = scmp.lt.s32.totalorder %s1934_s8, %s1934_s8 }
   0xe   :  { %p1941_p6 = por %p1940_p5, %p1939_p4 }
  0x10   :  { %p1942_p7 = pnand %p1941_p6, %p1935_p3 }
  0x12   :  { %1945 = shalt.err (!%p1942_p7)
}
  0x13   :  { %36 = dma.hbm_to_vmem [thread:$0]  %s2592_s1, 128, %s34_s22, [#allocation7]  }
  0x14   :  { %s1946_s13 = scalar_lea.hbm %s2591_s0, 512 }
  0x15   :  { %p1947_p8 = scmp.ne.s32.totalorder %s2591_s0, %s1946_s13  ;;  %p1950_p9 = scmp.lt.u32.totalorder %s1946_s13, %s2591_s0 }
  0x17   :  { %p1952_p10 = pnand %p1950_p9, %p1947_p8 }
  0x19   :  { %1955 = shalt.err (!%p1952_p10)
}
  0x1a   :  { %s1956_s18 = scalar_lea.vmem %s2089_s24, 512  ;;  %p1961_p12 = scmp.lt.s32.totalorder %s2089_s24, %s2089_s24 }
  0x1b   :  { %p1957_p11 = scmp.ne.s32.totalorder %s2089_s24, %s1956_s18  ;;  %p1962_p13 = scmp.lt.s32.totalorder %s1956_s18, %s1956_s18 }
  0x1d   :  { %p1963_p0 = por %p1962_p13, %p1961_p12 }
  0x1f   :  { %p1964_p1 = pnand %p1963_p0, %p1957_p11 }
  0x21   :  { %1967 = shalt.err (!%p1964_p1)
}
  0x22   :  { %s2044_s1 = smov 64   ;;  %s2045_s19 = smov 4  }
  0x23   :  { %26 = dma.hbm_to_vmem [thread:$0]  %s2591_s0, 512, %s2089_s24, [#allocation4], %s2044_s1, %s2044_s1, %s2045_s19  }
  0x24   :  { %s2046_s22 = smov [#allocation8]   ;;  %s1968_s27 = scalar_lea.hbm %s2593_s2, 3072 }
  0x25   :  { %s42_s23 = sshll.u32 %s2046_s22, 4  ;;  %p1969_p2 = scmp.ne.s32.totalorder %s2593_s2, %s1968_s27  ;;  %s43_s23 = int_to_ptr.vmem [resolvable:$true] %s42_s23 }
  0x26   :  { %p1972_p3 = scmp.lt.u32.totalorder %s1968_s27, %s2593_s2 }
  0x28   :  { %p1974_p4 = pnand %p1972_p3, %p1969_p2 }
  0x2a   :  { %1977 = shalt.err (!%p1974_p4)
}
  0x2b   :  { %s1978_s8 = scalar_lea.vmem %s43_s23, 3072  ;;  %p1983_p6 = scmp.lt.s32.totalorder %s43_s23, %s43_s23 }
  0x2c   :  { %p1979_p5 = scmp.ne.s32.totalorder %s43_s23, %s1978_s8  ;;  %p1984_p7 = scmp.lt.s32.totalorder %s1978_s8, %s1978_s8 }
  0x2e   :  { %p1985_p8 = por %p1984_p7, %p1983_p6 }
  0x30   :  { %p1986_p9 = pnand %p1985_p8, %p1979_p5 }
  0x32   :  { %1989 = shalt.err (!%p1986_p9)
}
  0x33   :  { %s2047_s0 = smov 192   ;;  %s2048_s24 = smov 12  }
  0x34   :  { %48 = dma.hbm_to_vmem [thread:$0]  %s2593_s2, 3072, %s43_s23, [#allocation7], %s2047_s0, %s2047_s0, %s2048_s24  }
  0x35   :  { %s2049_s11 = smov [#allocation9]   ;;  %s1990_s15 = scalar_lea.hbm %s2594_s3, 3072 }
  0x36   :  { %s54_s12 = sshll.u32 %s2049_s11, 4  ;;  %p1991_p10 = scmp.ne.s32.totalorder %s2594_s3, %s1990_s15  ;;  %s55_s12 = int_to_ptr.vmem [resolvable:$true] %s54_s12 }
  0x37   :  { %p1994_p11 = scmp.lt.u32.totalorder %s1990_s15, %s2594_s3 }
  0x39   :  { %p1996_p12 = pnand %p1994_p11, %p1991_p10 }
  0x3b   :  { %1999 = shalt.err (!%p1996_p12)
}
  0x3c   :  { %s2000_s19 = scalar_lea.vmem %s55_s12, 3072  ;;  %p2005_p0 = scmp.lt.s32.totalorder %s55_s12, %s55_s12 }
  0x3d   :  { %p2001_p13 = scmp.ne.s32.totalorder %s55_s12, %s2000_s19  ;;  %p2006_p1 = scmp.lt.s32.totalorder %s2000_s19, %s2000_s19 }
  0x3f   :  { %p2007_p2 = por %p2006_p1, %p2005_p0 }
  0x41   :  { %p2008_p3 = pnand %p2007_p2, %p2001_p13 }
  0x43   :  { %2011 = shalt.err (!%p2008_p3)
}
  0x44   :  { %60 = dma.hbm_to_vmem [thread:$0]  %s2594_s3, 3072, %s55_s12, [#allocation10], %s2047_s0, %s2047_s0, %s2048_s24  }
  0x45   :  { %2034 = dma.done.wait [#allocation4], 512  }
  0x46   :  { %2035 = vsyncadd [#allocation4], 4294966784 }
  0x47   :  { %2036 = dma.done.wait [#allocation7], 3200  }
  0x48   :  { %2037 = vsyncadd [#allocation7], 4294964096 }
  0x49   :  { %2038 = dma.done.wait [#allocation10], 3072  }
  0x4a   :  { %2039 = vsyncadd [#allocation10], 4294964224  ;;  %v2598_v0 = vmov 0   ;;  %v1797_v1 = vld [vmem:[#allocation8 + $0x4] ss:$12 sps:$4 sm:$0xff]   ;;  %v1826_v16 = vld [vmem:[#allocation3] sm:$0xff]   ;;  %v126_v56 = vlaneseq }
  0x4b   :  { %325 = vmatprep.mubr.bf16.mxu0 %v2598_v0  ;;  %v1799_v2 = vld [vmem:[#allocation8] ss:$12 sps:$4 sm:$0xff]   ;;  %293 = vmatprep.subr.bf16.mxu0 %v1797_v1  ;;  %v1800_v3 = vld [vmem:[#allocation8 + $0x1c] ss:$12 sps:$4 sm:$0xff]   ;;  %v1802_v4 = vld [vmem:[#allocation8 + $0x18] ss:$12 sps:$4 sm:$0xff]  }
  0x4c   :  { %294 = vmatpush1.bf16.msra.mxu0 %v1799_v2  ;;  %v1803_v5 = vld [vmem:[#allocation8 + $0x34] ss:$12 sps:$4 sm:$0xff]   ;;  %v1805_v7 = vld [vmem:[#allocation8 + $0x30] ss:$12 sps:$4 sm:$0xff]   ;;  %v1806_v8 = vld [vmem:[#allocation8 + $0x4c] ss:$12 sps:$4 sm:$0xff]   ;;  %1617 = vmatprep.mubr.bf16.mxu1 %v1826_v16 }
  0x4d   :  { %295 = vmatprep.subr.bf16.mxu0 %v1800_v3  ;;  %v1809_v6 = vld [vmem:[#allocation8 + $0x8] ss:$12 sps:$4 sm:$0xff]   ;;  %v1813_v9 = vld [vmem:[#allocation8 + $0x20] ss:$12 sps:$4 sm:$0xff]   ;;  %v1817_v10 = vld [vmem:[#allocation8 + $0x38] ss:$12 sps:$4 sm:$0xff]  }
  0x4e   :  { %1601 = vmatprep.subr.bf16.mxu1 %v1809_v6  ;;  %v1808_v11 = vld [vmem:[#allocation8 + $0x48] ss:$12 sps:$4 sm:$0xff]   ;;  %v1810_v12 = vld [vmem:[#allocation8 + $0x64] ss:$12 sps:$4 sm:$0xff]   ;;  %v1812_v13 = vld [vmem:[#allocation8 + $0x60] ss:$12 sps:$4 sm:$0xff]  }
  0x4f   :  { %1602 = vmatpush3.bf16.msra.mxu1 %v1809_v6  ;;  %v1821_v14 = vld [vmem:[#allocation8 + $0x50] ss:$12 sps:$4 sm:$0xff]   ;;  %v1825_v17 = vld [vmem:[#allocation8 + $0x68] ss:$12 sps:$4 sm:$0xff]   ;;  %v1816_v18 = vld [vmem:[#allocation8 + $0x78] ss:$12 sps:$4 sm:$0xff]  }
  0x50   :  { %296 = vmatpush1.bf16.msra.mxu0 %v1802_v4  ;;  %1603 = vmatprep.subr.bf16.mxu1 %v1813_v9  ;;  %v1814_v15 = vld [vmem:[#allocation8 + $0x7c] ss:$12 sps:$4 sm:$0xff]   ;;  %v1818_v19 = vld [vmem:[#allocation8 + $0x94] ss:$12 sps:$4 sm:$0xff]   ;;  %v1822_v22 = vld [vmem:[#allocation8 + $0xac] ss:$12 sps:$4 sm:$0xff]  }
  0x51   :  { %297 = vmatprep.subr.bf16.mxu0 %v1803_v5  ;;  %v1830_v20 = vld [vmem:[#allocation8 + $0x80] ss:$12 sps:$4 sm:$0xff]   ;;  %v1820_v21 = vld [vmem:[#allocation8 + $0x90] ss:$12 sps:$4 sm:$0xff]   ;;  %v1834_v23 = vld [vmem:[#allocation8 + $0x98] ss:$12 sps:$4 sm:$0xff]  }
  0x52   :  { %v1824_v24 = vld [vmem:[#allocation8 + $0xa8] ss:$12 sps:$4 sm:$0xff]   ;;  %v2145_v25 = vld [vmem:[#allocation9 + $0x4] ss:$12 sps:$4 sm:$0xff]   ;;  %v2147_v27 = vld [vmem:[#allocation9] ss:$12 sps:$4 sm:$0xff]  }
  0x53   :  { %1604 = vmatpush3.bf16.msra.mxu1 %v1813_v9  ;;  %v1839_v26 = vld [vmem:[#allocation8 + $0xb0] ss:$12 sps:$4 sm:$0xff]   ;;  %v2153_v29 = vld [vmem:[#allocation9 + $0x18] ss:$12 sps:$4 sm:$0xff]   ;;  %v2157_v30 = vld [vmem:[#allocation9 + $0x34] ss:$12 sps:$4 sm:$0xff]  }
  0x54   :  { %298 = vmatpush1.bf16.msra.mxu0 %v1805_v7  ;;  %1605 = vmatprep.subr.bf16.mxu1 %v1817_v10  ;;  %v2150_v28 = vld [vmem:[#allocation9 + $0x1c] ss:$12 sps:$4 sm:$0xff]   ;;  %v1835_v31 = vld [vmem:[#allocation3 + $0x8] sm:$0xff]   ;;  %v2600_v34 = vmov 0.0   ;;  %v2166_v36 = vld [vmem:[#allocation9 + $0x4c] ss:$12 sps:$4 sm:$0xff]  }
  0x55   :  { %299 = vmatprep.subr.bf16.mxu0 %v1806_v8  ;;  %v2159_v32 = vld [vmem:[#allocation9 + $0x8] ss:$12 sps:$4 sm:$0xff]   ;;  %v2161_v33 = vld [vmem:[#allocation9 + $0x30] ss:$12 sps:$4 sm:$0xff]   ;;  %v2169_v37 = vld [vmem:[#allocation9 + $0x20] ss:$12 sps:$4 sm:$0xff]  }
  0x56   :  { %v1843_v35 = vld [vmem:[#allocation3 + $0x10] sm:$0xff]   ;;  %v2177_v39 = vld [vmem:[#allocation9 + $0x64] ss:$12 sps:$4 sm:$0xff]   ;;  %vm2052_vm0 = vmmov 0   ;;  %v2200_v46 = vld [vmem:[#allocation9 + $0x94] ss:$12 sps:$4 sm:$0xff]  }
  0x57   :  { %1606 = vmatpush3.bf16.msra.mxu1 %v1817_v10  ;;  %v2173_v38 = vld [vmem:[#allocation9 + $0x48] ss:$12 sps:$4 sm:$0xff]   ;;  %v2180_v40 = vld [vmem:[#allocation9 + $0x38] ss:$12 sps:$4 sm:$0xff]   ;;  %v2184_v42 = vld [vmem:[#allocation9 + $0x60] ss:$12 sps:$4 sm:$0xff]  }
  0x58   :  { %300 = vmatpush1.bf16.msra.mxu0 %v1808_v11  ;;  %1607 = vmatprep.subr.bf16.mxu1 %v1821_v14  ;;  %v1852_v41 = vld [vmem:[#allocation3 + $0x18] sm:$0xff]   ;;  %v2187_v43 = vld [vmem:[#allocation9 + $0x7c] ss:$12 sps:$4 sm:$0xff]   ;;  %v2196_v45 = vld [vmem:[#allocation9 + $0x78] ss:$12 sps:$4 sm:$0xff]   ;;  %v127_v57 = vshrl.u32 %v126_v56, 7 }
  0x59   :  { %301 = vmatprep.subr.bf16.mxu0 %v1810_v12  ;;  %v2190_v44 = vld [vmem:[#allocation9 + $0x50] ss:$12 sps:$4 sm:$0xff]   ;;  %v2203_v47 = vld [vmem:[#allocation9 + $0x68] ss:$12 sps:$4 sm:$0xff]   ;;  %v2210_v49 = vld [vmem:[#allocation9 + $0xac] ss:$12 sps:$4 sm:$0xff]  }
  0x5a   :  { %v2207_v48 = vld [vmem:[#allocation9 + $0x90] ss:$12 sps:$4 sm:$0xff]   ;;  %v2213_v50 = vld [vmem:[#allocation9 + $0x80] ss:$12 sps:$4 sm:$0xff]   ;;  %v2217_v51 = vld [vmem:[#allocation9 + $0xa8] ss:$12 sps:$4 sm:$0xff]  }
  0x5b   :  { %1608 = vmatpush3.bf16.msra.mxu1 %v1821_v14  ;;  %v2220_v52 = vld [vmem:[#allocation6] sm:$0xff]  ;;  %v128_v58 = vsub.s32 0, %v127_v57  ;;  %v132_v60 = vsub.s32 1, %v127_v57  ;;  %v136_v61 = vsub.s32 2, %v127_v57 }
  0x5c   :  { %302 = vmatpush1.bf16.msra.mxu0 %v1812_v13  ;;  %1609 = vmatprep.subr.bf16.mxu1 %v1825_v17  ;;  %v2224_v53 = vld [vmem:[#allocation9 + $0x98] ss:$12 sps:$4 sm:$0xff]   ;;  %v498_v54 = vpack.c.bf16 %v2220_v52, %v2220_v52  ;;  %v2232_v55 = vld [vmem:[#allocation9 + $0xb0] ss:$12 sps:$4 sm:$0xff]  }
  0x5d   :  { %303 = vmatprep.subr.bf16.mxu0 %v1814_v15  ;;  %v124_v59 = vld [vmem:[%s2595_s4] sm:$0x7] }
  0x5e   :  { %v129_v63 = vrot.slane %v124_v59, %v128_v58  ;;  %v133_v2 = vrot.slane %v124_v59, %v132_v60  ;;  %v137_v6 = vrot.slane %v124_v59, %v136_v61 }
  0x5f   :  { %1610 = vmatpush3.bf16.msra.mxu1 %v1825_v17 }
  0x60   :  { %304 = vmatpush1.bf16.msra.mxu0 %v1816_v18  ;;  %1611 = vmatprep.subr.bf16.mxu1 %v1830_v20 }
  0x61   :  { %305 = vmatprep.subr.bf16.mxu0 %v1818_v19 }
  0x63   :  { %1612 = vmatpush3.bf16.msra.mxu1 %v1830_v20 }
  0x64   :  { %306 = vmatpush1.bf16.msra.mxu0 %v1820_v21  ;;  %1613 = vmatprep.subr.bf16.mxu1 %v1834_v23 }
  0x65   :  { %307 = vmatprep.subr.bf16.mxu0 %v1822_v22 }
  0x67   :  { %1614 = vmatpush3.bf16.msra.mxu1 %v1834_v23 }
  0x68   :  { %308 = vmatpush1.bf16.msra.mxu0 %v1824_v24  ;;  %1615 = vmatprep.subr.bf16.mxu1 %v1839_v26 }
  0x69   :  { %627 = vmatprep.subr.bf16.mxu0 %v2145_v25 }
  0x6b   :  { %326 = vmatmul.mubr.bf16.vlgmr.msra.gmra.mrb[0].mxu0 %v1826_v16  ;;  %1616 = vmatpush3.bf16.msra.mxu1 %v1839_v26 }
  0x6c   :  { %628 = vmatpush1.bf16.msra.mxu0 %v2147_v27  ;;  %335 = vmatprep.mubr.bf16.mxu0 %v2598_v0 }
  0x6d   :  { %629 = vmatprep.subr.bf16.mxu0 %v2150_v28  ;;  %1625 = vmatprep.subr.bf16.mxu1 %v2600_v34 }
  0x6e   :  { %1618 = vmatmul.mubr.bf16.vlgmr.msra.gmra.mrb[0].mxu1 %v1835_v31 }
  0x6f   :  { %1626 = vmatpush3.bf16.msra.mxu1 %v2159_v32  ;;  %1621 = vmatprep.mubr.bf16.mxu1 %v1843_v35 }
  0x70   :  { %630 = vmatpush1.bf16.msra.mxu0 %v2153_v29  ;;  %1627 = vmatprep.subr.bf16.mxu1 %v2600_v34 }
  0x71   :  { %631 = vmatprep.subr.bf16.mxu0 %v2157_v30 }
  0x73   :  { %336 = vmatmul.mubr.bf16.gmra.mrb[4].mxu0 %v1835_v31  ;;  %1628 = vmatpush3.bf16.msra.mxu1 %v2169_v37 }
  0x74   :  { %632 = vmatpush1.bf16.msra.mxu0 %v2161_v33  ;;  %345 = vmatprep.mubr.bf16.mxu0 %v2598_v0 }
  0x75   :  { %633 = vmatprep.subr.bf16.mxu0 %v2166_v36  ;;  %1629 = vmatprep.subr.bf16.mxu1 %v2600_v34 }
  0x76   :  { %1622 = vmatmul.mubr.bf16.gmra.mrb[4].mxu1 %v1852_v41 }
  0x77   :  { %1630 = vmatpush3.bf16.msra.mxu1 %v2180_v40  ;;  %1641 = vmatprep.mubr.msk.bf16.mxu1 %vm2052_vm0, %v2600_v34 }
  0x78   :  { %634 = vmatpush1.bf16.msra.mxu0 %v2173_v38  ;;  %1631 = vmatprep.subr.bf16.mxu1 %v2600_v34 }
  0x79   :  { %635 = vmatprep.subr.bf16.mxu0 %v2177_v39 }
  0x7b   :  { %346 = vmatmul.mubr.bf16.gmra.mrb[8].mxu0 %v1843_v35  ;;  %1632 = vmatpush3.bf16.msra.mxu1 %v2190_v44 }
  0x7c   :  { %636 = vmatpush1.bf16.msra.mxu0 %v2184_v42  ;;  %355 = vmatprep.mubr.bf16.mxu0 %v2598_v0 }
  0x7d   :  { %637 = vmatprep.subr.bf16.mxu0 %v2187_v43  ;;  %1633 = vmatprep.subr.bf16.mxu1 %v2600_v34 }
  0x7f   :  { %1634 = vmatpush3.bf16.msra.mxu1 %v2203_v47 }
  0x80   :  { %638 = vmatpush1.bf16.msra.mxu0 %v2196_v45  ;;  %1635 = vmatprep.subr.bf16.mxu1 %v2600_v34 }
  0x81   :  { %639 = vmatprep.subr.bf16.mxu0 %v2200_v46 }
  0x83   :  { %356 = vmatmul.mubr.bf16.gmra.mrb[12].mxu0 %v1852_v41  ;;  %1636 = vmatpush3.bf16.msra.mxu1 %v2213_v50 }
  0x84   :  { %640 = vmatpush1.bf16.msra.mxu0 %v2207_v48  ;;  %659 = vmatprep.mubr.bf16.mxu0 %v2598_v0 }
  0x85   :  { %641 = vmatprep.subr.bf16.mxu0 %v2210_v49  ;;  %1637 = vmatprep.subr.bf16.mxu1 %v2600_v34 }
  0x87   :  { %1638 = vmatpush3.bf16.msra.mxu1 %v2224_v53 }
  0x88   :  { %642 = vmatpush1.bf16.msra.mxu0 %v2217_v51  ;;  %1639 = vmatprep.subr.bf16.mxu1 %v2600_v34 }
  0x89   :  { %730 = vmatprep.subr.bf16.mxu0 %v2145_v25 }
  0x8b   :  { %660 = vmatmul.mubr.bf16.vlgmr.msra.gmra.mrb[16].mxu0 %v498_v54  ;;  %1640 = vmatpush3.bf16.msra.mxu1 %v2232_v55 }
  0x8c   :  { %731 = vmatpush1.bf16.msra.mxu0 %v2147_v27  ;;  %762 = vmatprep.mubr.bf16.mxu0 %v2598_v0 }
  0x8d   :  { %732 = vmatprep.subr.bf16.mxu0 %v2150_v28  ;;  %1645 = vmatprep.subr.bf16.mxu1 %v2600_v34 }
  0x8e   :  { %1642 = vmatmul.mubr.bf16.vlgmr.msra.gmra.mrb[8].mxu1 %v498_v54 }
  0x8f   :  { %1646 = vmatpush3.bf16.msra.mxu1 %v2159_v32  ;;  %1661 = vmatprep.mubr.msk.bf16.mxu1 %vm2052_vm0, %v2600_v34 }
  0x90   :  { %733 = vmatpush1.bf16.msra.mxu0 %v2153_v29  ;;  %1647 = vmatprep.subr.bf16.mxu1 %v2600_v34 }
  0x91   :  { %734 = vmatprep.subr.bf16.mxu0 %v2157_v30 }
  0x93   :  { %1648 = vmatpush3.bf16.msra.mxu1 %v2169_v37 }
  0x94   :  { %735 = vmatpush1.bf16.msra.mxu0 %v2161_v33  ;;  %1649 = vmatprep.subr.bf16.mxu1 %v2600_v34 }
  0x95   :  { %736 = vmatprep.subr.bf16.mxu0 %v2166_v36 }
  0x97   :  { %1650 = vmatpush3.bf16.msra.mxu1 %v2180_v40 }
  0x98   :  { %737 = vmatpush1.bf16.msra.mxu0 %v2173_v38  ;;  %1651 = vmatprep.subr.bf16.mxu1 %v2600_v34 }
  0x99   :  { %738 = vmatprep.subr.bf16.mxu0 %v2177_v39 }
  0x9b   :  { %1652 = vmatpush3.bf16.msra.mxu1 %v2190_v44 }
  0x9c   :  { %739 = vmatpush1.bf16.msra.mxu0 %v2184_v42  ;;  %1653 = vmatprep.subr.bf16.mxu1 %v2600_v34 }
  0x9d   :  { %740 = vmatprep.subr.bf16.mxu0 %v2187_v43 }
  0x9f   :  { %1654 = vmatpush3.bf16.msra.mxu1 %v2203_v47 }
  0xa0   :  { %741 = vmatpush1.bf16.msra.mxu0 %v2196_v45  ;;  %1655 = vmatprep.subr.bf16.mxu1 %v2600_v34 }
  0xa1   :  { %742 = vmatprep.subr.bf16.mxu0 %v2200_v46 }
  0xa3   :  { %1656 = vmatpush3.bf16.msra.mxu1 %v2213_v50 }
  0xa4   :  { %743 = vmatpush1.bf16.msra.mxu0 %v2207_v48  ;;  %1657 = vmatprep.subr.bf16.mxu1 %v2600_v34 }
  0xa5   :  { %744 = vmatprep.subr.bf16.mxu0 %v2210_v49 }
  0xa7   :  { %1658 = vmatpush3.bf16.msra.mxu1 %v2224_v53 }
  0xa8   :  { %745 = vmatpush1.bf16.msra.mxu0 %v2217_v51  ;;  %1659 = vmatprep.subr.bf16.mxu1 %v2600_v34 }
  0xa9   :  { %833 = vmatprep.subr.bf16.mxu0 %v2145_v25 }
  0xab   :  { %1660 = vmatpush3.bf16.msra.mxu1 %v2232_v55 }
  0xac   :  { %1665 = vmatprep.subr.bf16.mxu1 %v2600_v34 }
 0x13e   :  { %v327_v62 = vpop.f32.mrb[0].mxu0 }
 0x13f   :  { %v329_v1 = vpop.f32.mrb[1].mxu0 }
 0x140   :  { %v331_v3 = vpop.f32.mrb[2].mxu0 }
 0x141   :  { %v2275_v4 = vadd.f32 %v331_v3, %v129_v63  ;;  %v333_v5 = vpop.f32.mrb[3].mxu0  ;;  %v1619_v8 = vpop.f32.mrb[0].mxu1 }
 0x142   :  { %v2277_v7 = vadd.f32 %v333_v5, %v133_v2  ;;  %v2279_v9 = vadd.f32 %v1619_v8, %v137_v6  ;;  %v400_v10 = vpop.f32.mrb[1].mxu1 }
 0x143   :  { %v1620_v12 = vpop.f32.mrb[2].mxu1 }
 0x144   :  { %v2283_v15 = vadd.f32 %v1620_v12, %v137_v6  ;;  %v403_v16 = vpop.f32.mrb[3].mxu1 }
 0x145   :  { %v2287_v19 = vadd.f32 %v403_v16, %v137_v6 }
 0x146   :  { %v337_v11 = vpop.f32.mrb[4].mxu0 }
 0x147   :  { %v2281_v13 = vadd.f32 %v337_v11, %v129_v63  ;;  %v339_v14 = vpop.f32.mrb[5].mxu0 }
 0x148   :  { %v2285_v17 = vadd.f32 %v339_v14, %v133_v2  ;;  %v341_v18 = vpop.f32.mrb[6].mxu0 }
 0x149   :  { %v2289_v20 = vadd.f32 %v341_v18, %v129_v63  ;;  %v343_v21 = vpop.f32.mrb[7].mxu0  ;;  %v1623_v23 = vpop.f32.mrb[4].mxu1 }
 0x14a   :  { %v2291_v22 = vadd.f32 %v343_v21, %v133_v2  ;;  %v2293_v24 = vadd.f32 %v1623_v23, %v137_v6  ;;  %v416_v26 = vpop.f32.mrb[5].mxu1 }
 0x14b   :  { %v2295_v35 = vadd.f32 %v416_v26, %v137_v6  ;;  %v1624_v41 = vpop.f32.mrb[6].mxu1 }
 0x14c   :  { %2602 = vst [vmem:[#allocation16_spill] sm:$0xff] %v2293_v24  ;;  %v2299_v57 = vadd.f32 %v1624_v41, %v137_v6  ;;  %v419_v58 = vpop.f32.mrb[7].mxu1  ;;  %v330_v41 = vadd.f32 %v329_v1, %v133_v2 }
 0x14d   :  { %v2303_v61 = vadd.f32 %v419_v58, %v137_v6 }
 0x14e   :  { %v347_v31 = vpop.f32.mrb[8].mxu0  ;;  %2603 = vst [vmem:[#allocation17_spill] sm:$0xff] %v2299_v57 }
 0x14f   :  { %v2297_v54 = vadd.f32 %v347_v31, %v129_v63  ;;  %v349_v56 = vpop.f32.mrb[9].mxu0  ;;  %v328_v31 = vadd.f32 %v327_v62, %v129_v63 }
 0x150   :  { %v2301_v59 = vadd.f32 %v349_v56, %v133_v2  ;;  %v351_v60 = vpop.f32.mrb[10].mxu0 }
 0x151   :  { %v2305_v3 = vadd.f32 %v351_v60, %v129_v63  ;;  %v353_v5 = vpop.f32.mrb[11].mxu0 }
 0x152   :  { %v2307_v8 = vadd.f32 %v353_v5, %v133_v2 }
 0x156   :  { %v357_v11 = vpop.f32.mrb[12].mxu0 }
 0x157   :  { %v2309_v12 = vadd.f32 %v357_v11, %v129_v63  ;;  %v359_v14 = vpop.f32.mrb[13].mxu0 }
 0x158   :  { %v2311_v16 = vadd.f32 %v359_v14, %v133_v2  ;;  %v361_v18 = vpop.f32.mrb[14].mxu0 }
 0x159   :  { %v2313_v21 = vadd.f32 %v361_v18, %v129_v63  ;;  %v363_v23 = vpop.f32.mrb[15].mxu0  ;;  %v2320_v18 = vld [vmem:[%s2596_s5] ss:$0 sm:$0xff]  ;;  %s2053_s5 = smov [#allocation11]  }
 0x15a   :  { %2604 = vst [vmem:[#allocation18_spill] sm:$0xff] %v2311_v16  ;;  %v2315_v26 = vadd.f32 %v363_v23, %v133_v2  ;;  %s1453_s23 = sshll.u32 %s2053_s5, 4  ;;  %s1454_s23 = int_to_ptr.vmem [resolvable:$true] %s1453_s23 }
 0x15b   :  { %s2012_s25 = scalar_lea.vmem %s1454_s23, 128  ;;  %p2017_p5 = scmp.lt.s32.totalorder %s1454_s23, %s1454_s23 }
 0x15c   :  { %p2013_p4 = scmp.ne.s32.totalorder %s1454_s23, %s2012_s25  ;;  %p2018_p6 = scmp.lt.s32.totalorder %s2012_s25, %s2012_s25 }
 0x15e   :  { %v661_v56 = vpop.f32.mrb[16].mxu0  ;;  %p2019_p7 = por %p2018_p6, %p2017_p5 }
 0x15f   :  { %v708_v58 = vadd.f32 %v661_v56, %v328_v31  ;;  %v663_v60 = vpop.f32.mrb[17].mxu0  ;;  %v401_v31 = vadd.f32 %v400_v10, %v137_v6  ;;  %v2605_v6 = vmov 0.0   ;;  %v2606_v10 = vmov 0  }
 0x160   :  { %v709_v0 = vadd.f32 %v663_v60, %v330_v41  ;;  %v665_v5 = vpop.f32.mrb[18].mxu0  ;;  %p2020_p8 = pnand %p2019_p7, %p2013_p4 }
 0x161   :  { %v710_v34 = vmul.f32 0.5, %v708_v58  ;;  %v666_v57 = vpop.f32.mrb[19].mxu0  ;;  %v702_v11 = vpop.f32.mrb[8].mxu1 }
 0x162   :  { %v1643_v24 = vpop.f32.mrb[9].mxu1  ;;  %v714_v23 = vmul.f32 0.5, %v709_v0  ;;  %v718_v1 = vadd.f32 %v2320_v18, %v702_v11 }
 0x163   :  { %1865 = vtanh.f32 %v710_v34  ;;  %v705_v14 = vpop.f32.mrb[10].mxu1 }
 0x164   :  { %v1644_v16 = vpop.f32.mrb[11].mxu1  ;;  %1867 = vtanh.f32 %v714_v23 }
 0x16d   :  { %v1866_v62 = vpop.eup %1865 }
 0x16e   :  { %v712_v63 = vmul.f32 0.5, %v1866_v62  ;;  %v1868_v34 = vpop.eup %1867 }
 0x16f   :  { %v716_v24 = vmul.f32 0.5, %v1868_v34 }
 0x170   :  { %v713_v2 = vadd.f32 0.5, %v712_v63 }
 0x171   :  { %v717_v16 = vadd.f32 0.5, %v716_v24 }
 0x172   :  { %v719_v41 = vmul.f32 %v718_v1, %v713_v2 }
 0x174   :  { %v720_v57 = vadd.f32 %v719_v41, %v401_v31 }
 0x176   :  { %1869 = vtanh.f32 %v720_v57 }
 0x180   :  { %v1870_v56 = vpop.eup %1869 }
 0x181   :  { %v722_v58 = vsub.f32 %v2220_v52, %v1870_v56 }
 0x183   :  { %v723_v60 = vmul.f32 %v722_v58, %v717_v16 }
 0x185   :  { %v2324_v5 = vadd.f32 %v1870_v56, %v723_v60 }
 0x187   :  { %v729_v0 = vpack.c.bf16 %v2324_v5, %v2324_v5 }
 0x189   :  { %763 = vmatmul.mubr.bf16.vlgmr.msra.gmra.mrb[20].mxu0 %v729_v0  ;;  %1662 = vmatmul.mubr.bf16.vlgmr.msra.gmra.mrb[12].mxu1 %v729_v0 }
 0x18a   :  { %834 = vmatpush1.bf16.msra.mxu0 %v2147_v27  ;;  %1666 = vmatpush3.bf16.msra.mxu1 %v2159_v32 }
 0x18b   :  { %835 = vmatprep.subr.bf16.mxu0 %v2150_v28  ;;  %1667 = vmatprep.subr.bf16.mxu1 %v2605_v6 }
 0x18c   :  { %865 = vmatprep.mubr.bf16.mxu0 %v2606_v10  ;;  %1681 = vmatprep.mubr.msk.bf16.mxu1 %vm2052_vm0, %v2605_v6 }
 0x18e   :  { %836 = vmatpush1.bf16.msra.mxu0 %v2153_v29  ;;  %1668 = vmatpush3.bf16.msra.mxu1 %v2169_v37 }
 0x18f   :  { %837 = vmatprep.subr.bf16.mxu0 %v2157_v30  ;;  %1669 = vmatprep.subr.bf16.mxu1 %v2605_v6 }
 0x192   :  { %838 = vmatpush1.bf16.msra.mxu0 %v2161_v33  ;;  %1670 = vmatpush3.bf16.msra.mxu1 %v2180_v40 }
 0x193   :  { %839 = vmatprep.subr.bf16.mxu0 %v2166_v36  ;;  %1671 = vmatprep.subr.bf16.mxu1 %v2605_v6 }
 0x196   :  { %840 = vmatpush1.bf16.msra.mxu0 %v2173_v38  ;;  %1672 = vmatpush3.bf16.msra.mxu1 %v2190_v44 }
 0x197   :  { %841 = vmatprep.subr.bf16.mxu0 %v2177_v39  ;;  %1673 = vmatprep.subr.bf16.mxu1 %v2605_v6 }
 0x19a   :  { %842 = vmatpush1.bf16.msra.mxu0 %v2184_v42  ;;  %1674 = vmatpush3.bf16.msra.mxu1 %v2203_v47 }
 0x19b   :  { %843 = vmatprep.subr.bf16.mxu0 %v2187_v43  ;;  %1675 = vmatprep.subr.bf16.mxu1 %v2605_v6 }
 0x19e   :  { %844 = vmatpush1.bf16.msra.mxu0 %v2196_v45  ;;  %1676 = vmatpush3.bf16.msra.mxu1 %v2213_v50 }
 0x19f   :  { %845 = vmatprep.subr.bf16.mxu0 %v2200_v46  ;;  %1677 = vmatprep.subr.bf16.mxu1 %v2605_v6 }
 0x1a2   :  { %846 = vmatpush1.bf16.msra.mxu0 %v2207_v48  ;;  %1678 = vmatpush3.bf16.msra.mxu1 %v2224_v53 }
 0x1a3   :  { %847 = vmatprep.subr.bf16.mxu0 %v2210_v49  ;;  %1679 = vmatprep.subr.bf16.mxu1 %v2605_v6 }
 0x1a6   :  { %848 = vmatpush1.bf16.msra.mxu0 %v2217_v51  ;;  %1680 = vmatpush3.bf16.msra.mxu1 %v2232_v55 }
 0x1a7   :  { %936 = vmatprep.subr.bf16.mxu0 %v2145_v25  ;;  %1685 = vmatprep.subr.bf16.mxu1 %v2605_v6 }
 0x25c   :  { %v764_v52 = vpop.f32.mrb[20].mxu0  ;;  %v805_v11 = vpop.f32.mrb[12].mxu1 }
 0x25d   :  { %v811_v14 = vadd.f32 %v764_v52, %v2275_v4  ;;  %v766_v23 = vpop.f32.mrb[21].mxu0  ;;  %v1663_v62 = vpop.f32.mrb[13].mxu1  ;;  %v821_v58 = vadd.f32 %v2320_v18, %v805_v11 }
 0x25e   :  { %v812_v63 = vadd.f32 %v766_v23, %v2277_v7  ;;  %v768_v1 = vpop.f32.mrb[22].mxu0  ;;  %v808_v2 = vpop.f32.mrb[14].mxu1 }
 0x25f   :  { %v813_v31 = vmul.f32 0.5, %v811_v14  ;;  %v769_v41 = vpop.f32.mrb[23].mxu0  ;;  %v1664_v57 = vpop.f32.mrb[15].mxu1 }
 0x260   :  { %v817_v34 = vmul.f32 0.5, %v812_v63 }
 0x261   :  { %1871 = vtanh.f32 %v813_v31 }
 0x262   :  { %1873 = vtanh.f32 %v817_v34 }
 0x26b   :  { %v1872_v24 = vpop.eup %1871 }
 0x26c   :  { %v815_v56 = vmul.f32 0.5, %v1872_v24  ;;  %v1874_v0 = vpop.eup %1873 }
 0x26d   :  { %v819_v52 = vmul.f32 0.5, %v1874_v0 }
 0x26e   :  { %v816_v16 = vadd.f32 0.5, %v815_v56 }
 0x26f   :  { %v820_v23 = vadd.f32 0.5, %v819_v52 }
 0x270   :  { %v822_v60 = vmul.f32 %v821_v58, %v816_v16 }
 0x272   :  { %v823_v4 = vadd.f32 %v822_v60, %v2287_v19 }
 0x274   :  { %1875 = vtanh.f32 %v823_v4 }
 0x27e   :  { %v1876_v7 = vpop.eup %1875 }
 0x27f   :  { %v825_v14 = vsub.f32 %v2324_v5, %v1876_v7 }
 0x281   :  { %v826_v62 = vmul.f32 %v825_v14, %v820_v23 }
 0x283   :  { %v2368_v1 = vadd.f32 %v1876_v7, %v826_v62 }
 0x285   :  { %v832_v63 = vpack.c.bf16 %v2368_v1, %v2368_v1 }
 0x287   :  { %866 = vmatmul.mubr.bf16.vlgmr.msra.gmra.mrb[24].mxu0 %v832_v63  ;;  %1682 = vmatmul.mubr.bf16.vlgmr.msra.gmra.mrb[16].mxu1 %v832_v63 }
 0x288   :  { %937 = vmatpush1.bf16.msra.mxu0 %v2147_v27  ;;  %1686 = vmatpush3.bf16.msra.mxu1 %v2159_v32 }
 0x289   :  { %938 = vmatprep.subr.bf16.mxu0 %v2150_v28  ;;  %1687 = vmatprep.subr.bf16.mxu1 %v2605_v6 }
 0x28a   :  { %968 = vmatprep.mubr.bf16.mxu0 %v2606_v10  ;;  %1701 = vmatprep.mubr.msk.bf16.mxu1 %vm2052_vm0, %v2605_v6 }
 0x28c   :  { %939 = vmatpush1.bf16.msra.mxu0 %v2153_v29  ;;  %1688 = vmatpush3.bf16.msra.mxu1 %v2169_v37 }
 0x28d   :  { %940 = vmatprep.subr.bf16.mxu0 %v2157_v30  ;;  %1689 = vmatprep.subr.bf16.mxu1 %v2605_v6 }
 0x290   :  { %941 = vmatpush1.bf16.msra.mxu0 %v2161_v33  ;;  %1690 = vmatpush3.bf16.msra.mxu1 %v2180_v40 }
 0x291   :  { %942 = vmatprep.subr.bf16.mxu0 %v2166_v36  ;;  %1691 = vmatprep.subr.bf16.mxu1 %v2605_v6 }
 0x294   :  { %943 = vmatpush1.bf16.msra.mxu0 %v2173_v38  ;;  %1692 = vmatpush3.bf16.msra.mxu1 %v2190_v44 }
 0x295   :  { %944 = vmatprep.subr.bf16.mxu0 %v2177_v39  ;;  %1693 = vmatprep.subr.bf16.mxu1 %v2605_v6 }
 0x298   :  { %945 = vmatpush1.bf16.msra.mxu0 %v2184_v42  ;;  %1694 = vmatpush3.bf16.msra.mxu1 %v2203_v47 }
 0x299   :  { %946 = vmatprep.subr.bf16.mxu0 %v2187_v43  ;;  %1695 = vmatprep.subr.bf16.mxu1 %v2605_v6 }
 0x29c   :  { %947 = vmatpush1.bf16.msra.mxu0 %v2196_v45  ;;  %1696 = vmatpush3.bf16.msra.mxu1 %v2213_v50 }
 0x29d   :  { %948 = vmatprep.subr.bf16.mxu0 %v2200_v46  ;;  %1697 = vmatprep.subr.bf16.mxu1 %v2605_v6 }
 0x2a0   :  { %949 = vmatpush1.bf16.msra.mxu0 %v2207_v48  ;;  %1698 = vmatpush3.bf16.msra.mxu1 %v2224_v53 }
 0x2a1   :  { %950 = vmatprep.subr.bf16.mxu0 %v2210_v49  ;;  %1699 = vmatprep.subr.bf16.mxu1 %v2605_v6 }
 0x2a4   :  { %951 = vmatpush1.bf16.msra.mxu0 %v2217_v51  ;;  %1700 = vmatpush3.bf16.msra.mxu1 %v2232_v55 }
 0x2a5   :  { %1039 = vmatprep.subr.bf16.mxu0 %v2145_v25  ;;  %1705 = vmatprep.subr.bf16.mxu1 %v2605_v6 }
 0x35a   :  { %v867_v19 = vpop.f32.mrb[24].mxu0  ;;  %v908_v5 = vpop.f32.mrb[16].mxu1 }
 0x35b   :  { %v914_v11 = vadd.f32 %v867_v19, %v2281_v13  ;;  %v869_v2 = vpop.f32.mrb[25].mxu0  ;;  %v1683_v31 = vpop.f32.mrb[17].mxu1  ;;  %v924_v52 = vadd.f32 %v2320_v18, %v908_v5 }
 0x35c   :  { %v915_v41 = vadd.f32 %v869_v2, %v2285_v17  ;;  %v871_v57 = vpop.f32.mrb[26].mxu0  ;;  %v911_v34 = vpop.f32.mrb[18].mxu1 }
 0x35d   :  { %v916_v24 = vmul.f32 0.5, %v914_v11  ;;  %v872_v56 = vpop.f32.mrb[27].mxu0  ;;  %v1684_v16 = vpop.f32.mrb[19].mxu1 }
 0x35e   :  { %v920_v58 = vmul.f32 0.5, %v915_v41 }
 0x35f   :  { %1877 = vtanh.f32 %v916_v24 }
 0x360   :  { %1879 = vtanh.f32 %v920_v58 }
 0x369   :  { %v1878_v60 = vpop.eup %1877 }
 0x36a   :  { %v918_v4 = vmul.f32 0.5, %v1878_v60  ;;  %v1880_v23 = vpop.eup %1879 }
 0x36b   :  { %v922_v14 = vmul.f32 0.5, %v1880_v23 }
 0x36c   :  { %v919_v0 = vadd.f32 0.5, %v918_v4 }
 0x36d   :  { %v923_v62 = vadd.f32 0.5, %v922_v14 }
 0x36e   :  { %v925_v7 = vmul.f32 %v924_v52, %v919_v0 }
 0x370   :  { %v926_v13 = vadd.f32 %v925_v7, %v2279_v9 }
 0x372   :  { %1881 = vtanh.f32 %v926_v13 }
 0x37c   :  { %v1882_v17 = vpop.eup %1881 }
 0x37d   :  { %v928_v63 = vsub.f32 %v2368_v1, %v1882_v17 }
 0x37f   :  { %v929_v19 = vmul.f32 %v928_v63, %v923_v62 }
 0x381   :  { %v2412_v11 = vadd.f32 %v1882_v17, %v929_v19 }
 0x383   :  { %v935_v2 = vpack.c.bf16 %v2412_v11, %v2412_v11 }
 0x385   :  { %969 = vmatmul.mubr.bf16.vlgmr.msra.gmra.mrb[28].mxu0 %v935_v2  ;;  %1702 = vmatmul.mubr.bf16.vlgmr.msra.gmra.mrb[20].mxu1 %v935_v2 }
 0x386   :  { %1040 = vmatpush1.bf16.msra.mxu0 %v2147_v27  ;;  %1706 = vmatpush3.bf16.msra.mxu1 %v2159_v32 }
 0x387   :  { %1041 = vmatprep.subr.bf16.mxu0 %v2150_v28  ;;  %1707 = vmatprep.subr.bf16.mxu1 %v2605_v6 }
 0x388   :  { %1071 = vmatprep.mubr.bf16.mxu0 %v2606_v10  ;;  %1721 = vmatprep.mubr.msk.bf16.mxu1 %vm2052_vm0, %v2605_v6 }
 0x38a   :  { %1042 = vmatpush1.bf16.msra.mxu0 %v2153_v29  ;;  %1708 = vmatpush3.bf16.msra.mxu1 %v2169_v37 }
 0x38b   :  { %1043 = vmatprep.subr.bf16.mxu0 %v2157_v30  ;;  %1709 = vmatprep.subr.bf16.mxu1 %v2605_v6 }
 0x38e   :  { %1044 = vmatpush1.bf16.msra.mxu0 %v2161_v33  ;;  %1710 = vmatpush3.bf16.msra.mxu1 %v2180_v40 }
 0x38f   :  { %1045 = vmatprep.subr.bf16.mxu0 %v2166_v36  ;;  %1711 = vmatprep.subr.bf16.mxu1 %v2605_v6 }
 0x392   :  { %1046 = vmatpush1.bf16.msra.mxu0 %v2173_v38  ;;  %1712 = vmatpush3.bf16.msra.mxu1 %v2190_v44 }
 0x393   :  { %1047 = vmatprep.subr.bf16.mxu0 %v2177_v39  ;;  %1713 = vmatprep.subr.bf16.mxu1 %v2605_v6 }
 0x396   :  { %1048 = vmatpush1.bf16.msra.mxu0 %v2184_v42  ;;  %1714 = vmatpush3.bf16.msra.mxu1 %v2203_v47 }
 0x397   :  { %1049 = vmatprep.subr.bf16.mxu0 %v2187_v43  ;;  %1715 = vmatprep.subr.bf16.mxu1 %v2605_v6 }
 0x39a   :  { %1050 = vmatpush1.bf16.msra.mxu0 %v2196_v45  ;;  %1716 = vmatpush3.bf16.msra.mxu1 %v2213_v50 }
 0x39b   :  { %1051 = vmatprep.subr.bf16.mxu0 %v2200_v46  ;;  %1717 = vmatprep.subr.bf16.mxu1 %v2605_v6 }
 0x39e   :  { %1052 = vmatpush1.bf16.msra.mxu0 %v2207_v48  ;;  %1718 = vmatpush3.bf16.msra.mxu1 %v2224_v53 }
 0x39f   :  { %1053 = vmatprep.subr.bf16.mxu0 %v2210_v49  ;;  %1719 = vmatprep.subr.bf16.mxu1 %v2605_v6 }
 0x3a2   :  { %1054 = vmatpush1.bf16.msra.mxu0 %v2217_v51  ;;  %1720 = vmatpush3.bf16.msra.mxu1 %v2232_v55 }
 0x3a3   :  { %1142 = vmatprep.subr.bf16.mxu0 %v2145_v25  ;;  %1725 = vmatprep.subr.bf16.mxu1 %v2605_v6 }
 0x458   :  { %v970_v9 = vpop.f32.mrb[28].mxu0  ;;  %v1011_v1 = vpop.f32.mrb[20].mxu1 }
 0x459   :  { %v1017_v5 = vadd.f32 %v970_v9, %v2289_v20  ;;  %v972_v31 = vpop.f32.mrb[29].mxu0  ;;  %v1703_v41 = vpop.f32.mrb[21].mxu1  ;;  %v1027_v7 = vadd.f32 %v2320_v18, %v1011_v1 }
 0x45a   :  { %v1018_v57 = vadd.f32 %v972_v31, %v2291_v22  ;;  %v974_v34 = vpop.f32.mrb[30].mxu0  ;;  %v1014_v24 = vpop.f32.mrb[22].mxu1 }
 0x45b   :  { %v1019_v56 = vmul.f32 0.5, %v1017_v5  ;;  %v975_v16 = vpop.f32.mrb[31].mxu0  ;;  %v1704_v58 = vpop.f32.mrb[23].mxu1 }
 0x45c   :  { %v1023_v60 = vmul.f32 0.5, %v1018_v57 }
 0x45d   :  { %1883 = vtanh.f32 %v1019_v56 }
 0x45e   :  { %1885 = vtanh.f32 %v1023_v60 }
 0x467   :  { %v1884_v4 = vpop.eup %1883 }
 0x468   :  { %v1021_v0 = vmul.f32 0.5, %v1884_v4  ;;  %v1886_v23 = vpop.eup %1885 }
 0x469   :  { %v1025_v14 = vmul.f32 0.5, %v1886_v23 }
 0x46a   :  { %v1022_v52 = vadd.f32 0.5, %v1021_v0 }
 0x46b   :  { %v1026_v17 = vadd.f32 0.5, %v1025_v14 }
 0x46c   :  { %v1028_v13 = vmul.f32 %v1027_v7, %v1022_v52 }
 0x46e   :  { %v1029_v20 = vadd.f32 %v1028_v13, %v2283_v15 }
 0x470   :  { %1887 = vtanh.f32 %v1029_v20 }
 0x47a   :  { %v1888_v22 = vpop.eup %1887 }
 0x47b   :  { %v1031_v62 = vsub.f32 %v2412_v11, %v1888_v22 }
 0x47d   :  { %v1032_v63 = vmul.f32 %v1031_v62, %v1026_v17 }
 0x47f   :  { %v2456_v19 = vadd.f32 %v1888_v22, %v1032_v63 }
 0x481   :  { %v1038_v2 = vpack.c.bf16 %v2456_v19, %v2456_v19 }
 0x483   :  { %1072 = vmatmul.mubr.bf16.vlgmr.msra.gmra.mrb[32].mxu0 %v1038_v2  ;;  %1722 = vmatmul.mubr.bf16.vlgmr.msra.gmra.mrb[24].mxu1 %v1038_v2 }
 0x484   :  { %1143 = vmatpush1.bf16.msra.mxu0 %v2147_v27  ;;  %1726 = vmatpush3.bf16.msra.mxu1 %v2159_v32 }
 0x485   :  { %1144 = vmatprep.subr.bf16.mxu0 %v2150_v28  ;;  %1727 = vmatprep.subr.bf16.mxu1 %v2605_v6 }
 0x486   :  { %1174 = vmatprep.mubr.bf16.mxu0 %v2606_v10  ;;  %1741 = vmatprep.mubr.msk.bf16.mxu1 %vm2052_vm0, %v2605_v6 }
 0x488   :  { %1145 = vmatpush1.bf16.msra.mxu0 %v2153_v29  ;;  %1728 = vmatpush3.bf16.msra.mxu1 %v2169_v37 }
 0x489   :  { %1146 = vmatprep.subr.bf16.mxu0 %v2157_v30  ;;  %1729 = vmatprep.subr.bf16.mxu1 %v2605_v6 }
 0x48c   :  { %1147 = vmatpush1.bf16.msra.mxu0 %v2161_v33  ;;  %1730 = vmatpush3.bf16.msra.mxu1 %v2180_v40 }
 0x48d   :  { %1148 = vmatprep.subr.bf16.mxu0 %v2166_v36  ;;  %1731 = vmatprep.subr.bf16.mxu1 %v2605_v6 }
 0x490   :  { %1149 = vmatpush1.bf16.msra.mxu0 %v2173_v38  ;;  %1732 = vmatpush3.bf16.msra.mxu1 %v2190_v44 }
 0x491   :  { %1150 = vmatprep.subr.bf16.mxu0 %v2177_v39  ;;  %1733 = vmatprep.subr.bf16.mxu1 %v2605_v6 }
 0x494   :  { %1151 = vmatpush1.bf16.msra.mxu0 %v2184_v42  ;;  %1734 = vmatpush3.bf16.msra.mxu1 %v2203_v47 }
 0x495   :  { %1152 = vmatprep.subr.bf16.mxu0 %v2187_v43  ;;  %1735 = vmatprep.subr.bf16.mxu1 %v2605_v6 }
 0x498   :  { %1153 = vmatpush1.bf16.msra.mxu0 %v2196_v45  ;;  %1736 = vmatpush3.bf16.msra.mxu1 %v2213_v50 }
 0x499   :  { %1154 = vmatprep.subr.bf16.mxu0 %v2200_v46  ;;  %1737 = vmatprep.subr.bf16.mxu1 %v2605_v6 }
 0x49c   :  { %1155 = vmatpush1.bf16.msra.mxu0 %v2207_v48  ;;  %1738 = vmatpush3.bf16.msra.mxu1 %v2224_v53 }
 0x49d   :  { %1156 = vmatprep.subr.bf16.mxu0 %v2210_v49  ;;  %1739 = vmatprep.subr.bf16.mxu1 %v2605_v6 }
 0x4a0   :  { %1157 = vmatpush1.bf16.msra.mxu0 %v2217_v51  ;;  %1740 = vmatpush3.bf16.msra.mxu1 %v2232_v55 }
 0x4a1   :  { %1245 = vmatprep.subr.bf16.mxu0 %v2145_v25  ;;  %1745 = vmatprep.subr.bf16.mxu1 %v2605_v6 }
 0x556   :  { %v1073_v15 = vpop.f32.mrb[32].mxu0  ;;  %v1114_v11 = vpop.f32.mrb[24].mxu1 }
 0x557   :  { %v1120_v9 = vadd.f32 %v1073_v15, %v2297_v54  ;;  %v1075_v1 = vpop.f32.mrb[33].mxu0  ;;  %v1723_v5 = vpop.f32.mrb[25].mxu1  ;;  %v1130_v4 = vadd.f32 %v2320_v18, %v1114_v11 }
 0x558   :  { %v1121_v31 = vadd.f32 %v1075_v1, %v2301_v59  ;;  %v1077_v41 = vpop.f32.mrb[34].mxu0  ;;  %v1117_v57 = vpop.f32.mrb[26].mxu1 }
 0x559   :  { %v1122_v34 = vmul.f32 0.5, %v1120_v9  ;;  %v1078_v24 = vpop.f32.mrb[35].mxu0  ;;  %v1724_v56 = vpop.f32.mrb[27].mxu1 }
 0x55a   :  { %v1126_v16 = vmul.f32 0.5, %v1121_v31  ;;  %v1914_v24 = vld [vmem:[#allocation9] ss:$12 sps:$4 sm:$0xff]   ;;  %v1915_v56 = vld [vmem:[#allocation9 + $0x8] ss:$12 sps:$4 sm:$0xff]  }
 0x55b   :  { %1889 = vtanh.f32 %v1122_v34 }
 0x55c   :  { %1891 = vtanh.f32 %v1126_v16  ;;  %v1917_v16 = vld [vmem:[#allocation9 + $0x18] ss:$12 sps:$4 sm:$0xff]  }
 0x565   :  { %v1890_v58 = vpop.eup %1889 }
 0x566   :  { %v1124_v60 = vmul.f32 0.5, %v1890_v58  ;;  %v1892_v52 = vpop.eup %1891  ;;  %v1918_v58 = vld [vmem:[#allocation9 + $0x20] ss:$12 sps:$4 sm:$0xff]  }
 0x567   :  { %v1128_v7 = vmul.f32 0.5, %v1892_v52 }
 0x568   :  { %v1125_v25 = vadd.f32 0.5, %v1124_v60  ;;  %v1919_v60 = vld [vmem:[#allocation9 + $0x34] ss:$12 sps:$4 sm:$0xff]  }
 0x569   :  { %v1129_v13 = vadd.f32 0.5, %v1128_v7 }
 0x56a   :  { %v1131_v0 = vmul.f32 %v1130_v4, %v1125_v25  ;;  %v1920_v25 = vld [vmem:[#allocation9 + $0x30] ss:$12 sps:$4 sm:$0xff]   ;;  %v1921_v4 = vld [vmem:[#allocation9 + $0x4c] ss:$12 sps:$4 sm:$0xff]  }
 0x56c   :  { %v1132_v54 = vadd.f32 %v1131_v0, %v2295_v35  ;;  %v1923_v0 = vld [vmem:[#allocation9 + $0x64] ss:$12 sps:$4 sm:$0xff]  }
 0x56e   :  { %1893 = vtanh.f32 %v1132_v54 }
 0x578   :  { %v1894_v59 = vpop.eup %1893 }
 0x579   :  { %v1134_v20 = vsub.f32 %v2456_v19, %v1894_v59 }
 0x57b   :  { %v1135_v23 = vmul.f32 %v1134_v20, %v1129_v13  ;;  %v2608_v13 = vld [vmem:[#allocation16_spill] sm:$0xff] }
 0x57d   :  { %v2500_v14 = vadd.f32 %v1894_v59, %v1135_v23 }
 0x57f   :  { %v1141_v22 = vpack.c.bf16 %v2500_v14, %v2500_v14 }
 0x581   :  { %1175 = vmatmul.mubr.bf16.vlgmr.msra.gmra.mrb[36].mxu0 %v1141_v22  ;;  %1742 = vmatmul.mubr.bf16.vlgmr.msra.gmra.mrb[28].mxu1 %v1141_v22 }
 0x582   :  { %1246 = vmatpush1.bf16.msra.mxu0 %v2147_v27  ;;  %1746 = vmatpush3.bf16.msra.mxu1 %v2159_v32  ;;  %v1913_v27 = vld [vmem:[#allocation9 + $0x4] ss:$12 sps:$4 sm:$0xff]  }
 0x583   :  { %1247 = vmatprep.subr.bf16.mxu0 %v2150_v28  ;;  %1747 = vmatprep.subr.bf16.mxu1 %v2605_v6 }
 0x584   :  { %1277 = vmatprep.mubr.bf16.mxu0 %v2606_v10  ;;  %1761 = vmatprep.mubr.msk.bf16.mxu1 %vm2052_vm0, %v2605_v6 }
 0x586   :  { %1248 = vmatpush1.bf16.msra.mxu0 %v2153_v29  ;;  %1748 = vmatpush3.bf16.msra.mxu1 %v2169_v37 }
 0x587   :  { %1249 = vmatprep.subr.bf16.mxu0 %v2157_v30  ;;  %1749 = vmatprep.subr.bf16.mxu1 %v2605_v6 }
 0x58a   :  { %1250 = vmatpush1.bf16.msra.mxu0 %v2161_v33  ;;  %1750 = vmatpush3.bf16.msra.mxu1 %v2180_v40 }
 0x58b   :  { %1251 = vmatprep.subr.bf16.mxu0 %v2166_v36  ;;  %1751 = vmatprep.subr.bf16.mxu1 %v2605_v6 }
 0x58e   :  { %1252 = vmatpush1.bf16.msra.mxu0 %v2173_v38  ;;  %1752 = vmatpush3.bf16.msra.mxu1 %v2190_v44 }
 0x58f   :  { %1253 = vmatprep.subr.bf16.mxu0 %v2177_v39  ;;  %1753 = vmatprep.subr.bf16.mxu1 %v2605_v6 }
 0x592   :  { %1254 = vmatpush1.bf16.msra.mxu0 %v2184_v42  ;;  %1754 = vmatpush3.bf16.msra.mxu1 %v2203_v47 }
 0x593   :  { %1255 = vmatprep.subr.bf16.mxu0 %v2187_v43  ;;  %1755 = vmatprep.subr.bf16.mxu1 %v2605_v6 }
 0x596   :  { %1256 = vmatpush1.bf16.msra.mxu0 %v2196_v45  ;;  %1756 = vmatpush3.bf16.msra.mxu1 %v2213_v50 }
 0x597   :  { %1257 = vmatprep.subr.bf16.mxu0 %v2200_v46  ;;  %1757 = vmatprep.subr.bf16.mxu1 %v2605_v6 }
 0x59a   :  { %1258 = vmatpush1.bf16.msra.mxu0 %v2207_v48  ;;  %1758 = vmatpush3.bf16.msra.mxu1 %v2224_v53 }
 0x59b   :  { %1259 = vmatprep.subr.bf16.mxu0 %v2210_v49  ;;  %1759 = vmatprep.subr.bf16.mxu1 %v2605_v6 }
 0x59e   :  { %1260 = vmatpush1.bf16.msra.mxu0 %v2217_v51  ;;  %1760 = vmatpush3.bf16.msra.mxu1 %v2232_v55 }
 0x59f   :  { %1348 = vmatprep.subr.bf16.mxu0 %v1913_v27  ;;  %1765 = vmatprep.subr.bf16.mxu1 %v2605_v6 }
 0x654   :  { %v1176_v28 = vpop.f32.mrb[36].mxu0  ;;  %v1217_v29 = vpop.f32.mrb[28].mxu1 }
 0x655   :  { %v1223_v30 = vadd.f32 %v1176_v28, %v2305_v3  ;;  %v1178_v32 = vpop.f32.mrb[37].mxu0  ;;  %v1743_v33 = vpop.f32.mrb[29].mxu1  ;;  %v1233_v15 = vadd.f32 %v2320_v18, %v1217_v29 }
 0x656   :  { %v1224_v36 = vadd.f32 %v1178_v32, %v2307_v8  ;;  %v1180_v37 = vpop.f32.mrb[38].mxu0  ;;  %v1220_v38 = vpop.f32.mrb[30].mxu1 }
 0x657   :  { %v1225_v39 = vmul.f32 0.5, %v1223_v30  ;;  %v1181_v35 = vpop.f32.mrb[39].mxu0  ;;  %v1744_v17 = vpop.f32.mrb[31].mxu1 }
 0x658   :  { %v1229_v62 = vmul.f32 0.5, %v1224_v36 }
 0x659   :  { %1895 = vtanh.f32 %v1225_v39 }
 0x65a   :  { %1897 = vtanh.f32 %v1229_v62 }
 0x663   :  { %v1896_v63 = vpop.eup %1895 }
 0x664   :  { %v1227_v19 = vmul.f32 0.5, %v1896_v63  ;;  %v1898_v9 = vpop.eup %1897 }
 0x665   :  { %v1231_v1 = vmul.f32 0.5, %v1898_v9 }
 0x666   :  { %v1228_v2 = vadd.f32 0.5, %v1227_v19 }
 0x667   :  { %v1232_v5 = vadd.f32 0.5, %v1231_v1 }
 0x668   :  { %v1234_v11 = vmul.f32 %v1233_v15, %v1228_v2 }
 0x66a   :  { %v1235_v3 = vadd.f32 %v1234_v11, %v2303_v61  ;;  %v1916_v61 = vld [vmem:[#allocation9 + $0x1c] ss:$12 sps:$4 sm:$0xff]  }
 0x66c   :  { %1899 = vtanh.f32 %v1235_v3 }
 0x676   :  { %v1900_v8 = vpop.eup %1899 }
 0x677   :  { %v1237_v31 = vsub.f32 %v2500_v14, %v1900_v8 }
 0x679   :  { %v1238_v41 = vmul.f32 %v1237_v31, %v1232_v5 }
 0x67b   :  { %v2543_v57 = vadd.f32 %v1900_v8, %v1238_v41  ;;  %v2609_v8 = vld [vmem:[#allocation17_spill] sm:$0xff] }
 0x67d   :  { %v1244_v34 = vpack.c.bf16 %v2543_v57, %v2543_v57 }
 0x67f   :  { %1278 = vmatmul.mubr.bf16.vlgmr.msra.gmra.mrb[40].mxu0 %v1244_v34  ;;  %1762 = vmatmul.mubr.bf16.vlgmr.msra.gmra.mrb[32].mxu1 %v1244_v34 }
 0x680   :  { %1349 = vmatpush1.bf16.msra.mxu0 %v1914_v24  ;;  %1766 = vmatpush3.bf16.msra.mxu1 %v1915_v56 }
 0x681   :  { %1350 = vmatprep.subr.bf16.mxu0 %v1916_v61  ;;  %1767 = vmatprep.subr.bf16.mxu1 %v2605_v6 }
 0x682   :  { %1380 = vmatprep.mubr.bf16.mxu0 %v2606_v10  ;;  %1781 = vmatprep.mubr.msk.bf16.mxu1 %vm2052_vm0, %v2605_v6  ;;  %v1922_v10 = vld [vmem:[#allocation9 + $0x48] ss:$12 sps:$4 sm:$0xff]  }
 0x684   :  { %1351 = vmatpush1.bf16.msra.mxu0 %v1917_v16  ;;  %1768 = vmatpush3.bf16.msra.mxu1 %v1918_v58 }
 0x685   :  { %1352 = vmatprep.subr.bf16.mxu0 %v1919_v60  ;;  %1769 = vmatprep.subr.bf16.mxu1 %v2605_v6 }
 0x688   :  { %1353 = vmatpush1.bf16.msra.mxu0 %v1920_v25  ;;  %1770 = vmatpush3.bf16.msra.mxu1 %v2180_v40 }
 0x689   :  { %1354 = vmatprep.subr.bf16.mxu0 %v1921_v4  ;;  %1771 = vmatprep.subr.bf16.mxu1 %v2605_v6 }
 0x68c   :  { %1355 = vmatpush1.bf16.msra.mxu0 %v1922_v10  ;;  %1772 = vmatpush3.bf16.msra.mxu1 %v2190_v44 }
 0x68d   :  { %1356 = vmatprep.subr.bf16.mxu0 %v1923_v0  ;;  %1773 = vmatprep.subr.bf16.mxu1 %v2605_v6 }
 0x690   :  { %1357 = vmatpush1.bf16.msra.mxu0 %v2184_v42  ;;  %1774 = vmatpush3.bf16.msra.mxu1 %v2203_v47 }
 0x691   :  { %1358 = vmatprep.subr.bf16.mxu0 %v2187_v43  ;;  %1775 = vmatprep.subr.bf16.mxu1 %v2605_v6 }
 0x694   :  { %1359 = vmatpush1.bf16.msra.mxu0 %v2196_v45  ;;  %1776 = vmatpush3.bf16.msra.mxu1 %v2213_v50 }
 0x695   :  { %1360 = vmatprep.subr.bf16.mxu0 %v2200_v46  ;;  %1777 = vmatprep.subr.bf16.mxu1 %v2605_v6  ;;  %v2607_v46 = vld [vmem:[#allocation18_spill] sm:$0xff] }
 0x698   :  { %1361 = vmatpush1.bf16.msra.mxu0 %v2207_v48  ;;  %1778 = vmatpush3.bf16.msra.mxu1 %v2224_v53 }
 0x699   :  { %1362 = vmatprep.subr.bf16.mxu0 %v2210_v49  ;;  %1779 = vmatprep.subr.bf16.mxu1 %v2605_v6 }
 0x69c   :  { %1363 = vmatpush1.bf16.msra.mxu0 %v2217_v51  ;;  %1780 = vmatpush3.bf16.msra.mxu1 %v2232_v55 }
 0x752   :  { %v1279_v40 = vpop.f32.mrb[40].mxu0  ;;  %v1320_v42 = vpop.f32.mrb[32].mxu1 }
 0x753   :  { %v1326_v43 = vadd.f32 %v1279_v40, %v2309_v12  ;;  %v1281_v44 = vpop.f32.mrb[41].mxu0  ;;  %v1763_v45 = vpop.f32.mrb[33].mxu1  ;;  %v1336_v55 = vadd.f32 %v2320_v18, %v1320_v42 }
 0x754   :  { %v1327_v47 = vadd.f32 %v1281_v44, %v2607_v46  ;;  %v1283_v50 = vpop.f32.mrb[42].mxu0  ;;  %v1323_v48 = vpop.f32.mrb[34].mxu1 }
 0x755   :  { %v1328_v54 = vmul.f32 0.5, %v1326_v43  ;;  %v1284_v53 = vpop.f32.mrb[43].mxu0  ;;  %v1764_v52 = vpop.f32.mrb[35].mxu1 }
 0x756   :  { %v1332_v49 = vmul.f32 0.5, %v1327_v47 }
 0x757   :  { %1901 = vtanh.f32 %v1328_v54 }
 0x758   :  { %1903 = vtanh.f32 %v1332_v49 }
 0x761   :  { %v1902_v6 = vpop.eup %1901 }
 0x762   :  { %v1330_v7 = vmul.f32 0.5, %v1902_v6  ;;  %v1904_v20 = vpop.eup %1903 }
 0x763   :  { %v1334_v23 = vmul.f32 0.5, %v1904_v20 }
 0x764   :  { %v1331_v51 = vadd.f32 0.5, %v1330_v7 }
 0x765   :  { %v1335_v22 = vadd.f32 0.5, %v1334_v23 }
 0x766   :  { %v1337_v59 = vmul.f32 %v1336_v55, %v1331_v51 }
 0x768   :  { %v1338_v12 = vadd.f32 %v1337_v59, %v2608_v13 }
 0x76a   :  { %1905 = vtanh.f32 %v1338_v12 }
 0x774   :  { %v1906_v14 = vpop.eup %1905 }
 0x775   :  { %v1340_v27 = vsub.f32 %v2543_v57, %v1906_v14 }
 0x777   :  { %v1341_v28 = vmul.f32 %v1340_v27, %v1335_v22 }
 0x779   :  { %v1342_v29 = vadd.f32 %v1906_v14, %v1341_v28 }
 0x77b   :  { %v1347_v30 = vpack.c.bf16 %v1342_v29, %v1342_v29 }
 0x77d   :  { %1381 = vmatmul.mubr.bf16.vlgmr.msra.gmra.mrb[44].mxu0 %v1347_v30  ;;  %1782 = vmatmul.mubr.bf16.vlgmr.msra.gmra.mrb[36].mxu1 %v1347_v30 }
 0x850   :  { %v1382_v32 = vpop.f32.mrb[44].mxu0  ;;  %v1423_v33 = vpop.f32.mrb[36].mxu1 }
 0x851   :  { %v1429_v36 = vadd.f32 %v1382_v32, %v2313_v21  ;;  %v1384_v37 = vpop.f32.mrb[45].mxu0  ;;  %v1783_v38 = vpop.f32.mrb[37].mxu1  ;;  %v1439_v9 = vadd.f32 %v2320_v18, %v1423_v33 }
 0x852   :  { %v1430_v39 = vadd.f32 %v1384_v37, %v2315_v26  ;;  %v1386_v35 = vpop.f32.mrb[46].mxu0  ;;  %v1426_v17 = vpop.f32.mrb[38].mxu1 }
 0x853   :  { %v1431_v62 = vmul.f32 0.5, %v1429_v36  ;;  %v1387_v63 = vpop.f32.mrb[47].mxu0  ;;  %v1784_v19 = vpop.f32.mrb[39].mxu1 }
 0x854   :  { %v1435_v2 = vmul.f32 0.5, %v1430_v39 }
 0x855   :  { %1907 = vtanh.f32 %v1431_v62 }
 0x856   :  { %1909 = vtanh.f32 %v1435_v2 }
 0x85f   :  { %v1908_v15 = vpop.eup %1907 }
 0x860   :  { %v1433_v11 = vmul.f32 0.5, %v1908_v15  ;;  %v1910_v5 = vpop.eup %1909 }
 0x861   :  { %v1437_v31 = vmul.f32 0.5, %v1910_v5 }
 0x862   :  { %v1434_v3 = vadd.f32 0.5, %v1433_v11 }
 0x863   :  { %v1438_v41 = vadd.f32 0.5, %v1437_v31 }
 0x864   :  { %v1440_v1 = vmul.f32 %v1439_v9, %v1434_v3 }
 0x866   :  { %v1441_v21 = vadd.f32 %v1440_v1, %v2609_v8 }
 0x868   :  { %1911 = vtanh.f32 %v1441_v21 }
 0x872   :  { %v1912_v26 = vpop.eup %1911 }
 0x873   :  { %v1443_v57 = vsub.f32 %v1342_v29, %v1912_v26 }
 0x875   :  { %v1444_v34 = vmul.f32 %v1443_v57, %v1438_v41 }
 0x877   :  { %v1445_v24 = vadd.f32 %v1912_v26, %v1444_v34 }
 0x879   :  { %1446 = vst [vmem:[#allocation11] sm:$0xff] %v1445_v24 }
 0x87a   :  { %2023 = shalt.err (!%p2020_p8)
}
 0x87b   :  { %s2024_s28 = scalar_lea.hbm %s2597_s6, 128 }
 0x87c   :  { %p2025_p9 = scmp.ne.s32.totalorder %s2597_s6, %s2024_s28  ;;  %p2028_p10 = scmp.lt.u32.totalorder %s2024_s28, %s2597_s6 }
 0x87e   :  { %p2030_p11 = pnand %p2028_p10, %p2025_p9 }
 0x880   :  { %2033 = shalt.err (!%p2030_p11)
}
 0x881   :  { %1456 = dma.vmem_to_hbm [thread:$0]  %s1454_s23, 128, %s2597_s6, [#allocation5]  }
 0x882   :  { %2040 = dma.done.wait [#allocation5], 128  }
 0x883   :  { %2041 = vsyncadd [#allocation5], 4294967168 }
 0x884   :  { %1460 = vsyncpa [#allocation4], 1 }
 0x885   :  { %1461 = vsyncpa [#allocation7], 1 }
 0x886   :  { %1462 = vsyncpa [#allocation10], 1 }
 0x887   :  { %1463 = vsyncpa [#allocation5], 1 }

</bundles_post_ra>
